<compile_context>
chip_gen: v5e
topology: v5e:2x2
jax: 0.10.0
libtpu: 0.0.40
codegen_flags: <defaults>
</compile_context>

<pallas_src>
import functools
import math

import jax
import jax.numpy as jnp
from jax.experimental import pallas as pl
from jax.experimental.pallas import tpu as pltpu


# ---------------------------------------------------------------------------
# Shared math helper (used by kernel and by the pure-JAX reference)
# ---------------------------------------------------------------------------
def _layernorm(x, gamma, beta, eps=1e-5):
    mu = jnp.mean(x, axis=-1, keepdims=True)
    var = jnp.mean((x - mu) ** 2, axis=-1, keepdims=True)
    return (x - mu) * jax.lax.rsqrt(var + eps) * gamma + beta


# ---------------------------------------------------------------------------
# One encoder layer: grid = (batch, query-tile)
# ---------------------------------------------------------------------------
def encoder_layer_kernel(src_ref, pos_ref,
                         wqk_ref, bqk_ref, wv_ref, bv_ref,
                         wo_ref, bo_ref,
                         w1_ref, b1_ref, w2_ref, b2_ref,
                         g1_ref, be1_ref, g2_ref, be2_ref,
                         gf_ref, bef_ref,
                         out_ref,
                         q_sc, k_sc, v_sc,
                         *, nhead, tq, apply_final_norm):
    qi = pl.program_id(1)
    S, D = src_ref.shape[1], src_ref.shape[2]
    hd = D // nhead
    scale = 1.0 / math.sqrt(hd)

    # ---- Q/K/V projections: once per batch element, cached head-major ------
    @pl.when(qi == 0)
    def _():
        x = src_ref[0]                                         # (S, D) f32
        qk_in = (x + pos_ref[0]).astype(jnp.bfloat16)
        # fused [Q|K] projection: one MXU pass with N = 2D
        qk = jnp.dot(qk_in, wqk_ref[...],
                     preferred_element_type=jnp.float32) + bqk_ref[0]   # (S, 2D)
        v = jnp.dot(x.astype(jnp.bfloat16), wv_ref[...],
                    preferred_element_type=jnp.float32) + bv_ref[0]     # (S, D)
        q = qk[:, :D] * scale
        k = qk[:, D:]
        # static per-head split, executed once per batch element only
        for h in range(nhead):
            sl = slice(h * hd, (h + 1) * hd)
            q_sc[h] = q[:, sl].astype(jnp.bfloat16)
            k_sc[h] = k[:, sl].astype(jnp.bfloat16)
            v_sc[h] = v[:, sl].astype(jnp.bfloat16)

    # ---- attention for this query tile, batched over heads -----------------
    row0 = pl.multiple_of(qi * tq, tq)
    qh = q_sc[:, pl.ds(row0, tq), :]                           # (H, tq, hd) bf16
    kh = k_sc[...]                                             # (H, S,  hd) bf16
    vh = v_sc[...]                                             # (H, S,  hd) bf16

    s = jax.lax.dot_general(qh, kh, (((2,), (2,)), ((0,), (0,))),
                            preferred_element_type=jnp.float32)      # (H, tq, S)
    s = s - jnp.max(s, axis=-1, keepdims=True)
    e = jnp.exp(s)
    p = e * pl.reciprocal(jnp.sum(e, axis=-1, keepdims=True), approx=True)
    oh = jax.lax.dot_general(p.astype(jnp.bfloat16), vh,
                             (((2,), (1,)), ((0,), (0,))),
                             preferred_element_type=jnp.float32)     # (H, tq, hd)

    # output projection with head-blocked Wo:  sum_h oh[h] @ Wo[h]  ==  concat @ Wo^T
    proj = jax.lax.dot_general(oh.astype(jnp.bfloat16), wo_ref[...],
                               (((2,), (1,)), ((0,), (0,))),
                               preferred_element_type=jnp.float32)   # (H, tq, D)
    attn = jnp.sum(proj, axis=0) + bo_ref[0]                          # (tq, D)

    x_tile = src_ref[0, pl.ds(row0, tq), :]                           # (tq, D) f32
    x1 = _layernorm(x_tile + attn, g1_ref[0], be1_ref[0])

    # ---- FFN (naturally tiled along S because we work per query tile) ------
    h1 = jnp.dot(x1.astype(jnp.bfloat16), w1_ref[...],
                 preferred_element_type=jnp.float32) + b1_ref[0]
    h1 = jnp.maximum(h1, 0.0)                                         # ReLU
    h2 = jnp.dot(h1.astype(jnp.bfloat16), w2_ref[...],
                 preferred_element_type=jnp.float32) + b2_ref[0]

    y = _layernorm(x1 + h2, g2_ref[0], be2_ref[0])
    if apply_final_norm:            # encoder-level norm fused into last layer
        y = _layernorm(y, gf_ref[0], bef_ref[0])
    out_ref[0] = y


# ---------------------------------------------------------------------------
# Host-side helpers
# ---------------------------------------------------------------------------
def _prep_layer(lp, nhead):
    """Pre-transpose / split / head-block weights, cast matmul weights to bf16."""
    D = lp["wo"].shape[0]
    hd = D // nhead
    wqkv = lp["wqkv"]                       # (3D, D) PyTorch in_proj layout
    bqkv = lp["bqkv"]                       # (3D,)
    f32 = jnp.float32
    return dict(
        wqk=wqkv[:2 * D].T.astype(jnp.bfloat16),                 # (D, 2D)
        bqk=bqkv[:2 * D].reshape(1, 2 * D).astype(f32),
        wv=wqkv[2 * D:].T.astype(jnp.bfloat16),                  # (D, D)
        bv=bqkv[2 * D:].reshape(1, D).astype(f32),
        wo=lp["wo"].T.reshape(nhead, hd, D).astype(jnp.bfloat16),  # head-blocked
        bo=lp["bo"].reshape(1, D).astype(f32),
        w1=lp["w1"].T.astype(jnp.bfloat16),                      # (D, F)
        b1=lp["b1"].reshape(1, -1).astype(f32),
        w2=lp["w2"].T.astype(jnp.bfloat16),                      # (F, D)
        b2=lp["b2"].reshape(1, D).astype(f32),
        g1=lp["g1"].reshape(1, D).astype(f32),
        be1=lp["be1"].reshape(1, D).astype(f32),
        g2=lp["g2"].reshape(1, D).astype(f32),
        be2=lp["be2"].reshape(1, D).astype(f32),
    )


def _const_spec(shape):
    nd = len(shape)
    return pl.BlockSpec(shape, lambda b, q, _nd=nd: (0,) * _nd)


def _pick_tq(S):
    for t in (128, 64, 32, 16, 8):
        if S % t == 0:
            return t
    return S


def _vmem_budget(S, D, F, nhead, tq):
    """Rough working-set estimate (bytes) with margin, clamped to a safe range."""
    f32, bf16, lane = 4, 2, 128
    pad = lambda n: max(n, lane)
    hd = D // nhead
    total = 2 * 2 * S * pad(D) * f32                     # src + pos (double-buffered)
    total += 2 * tq * pad(D) * f32                        # out tile
    w_elems = D * 2 * D + D * D + nhead * hd * pad(D) + D * pad(F) + F * pad(D)
    total += 2 * w_elems * bf16                           # weights, double-buffered
    total += 2 * (2 * D + 8 * pad(D) + pad(F)) * f32      # biases / LN params
    total += 3 * nhead * S * pad(hd) * bf16               # q/k/v scratch (lane-padded)
    total += nhead * tq * pad(S) * f32 * 3                # scores / exp / probs
    total += nhead * tq * (pad(hd) + pad(D)) * f32        # head outputs / projection
    total += tq * pad(F) * f32 * 2 + tq * pad(D) * f32 * 6
    return max(32 << 20, min(int(total * 1.5) + (4 << 20), 64 << 20))


def _run_layer(x, p, kp, gf, bef, nhead, tq, apply_final_norm):
    B, S, D = x.shape
    F = kp["w1"].shape[1]
    n_qt = S // tq
    weights = (kp["wqk"], kp["bqk"], kp["wv"], kp["bv"], kp["wo"], kp["bo"],
               kp["w1"], kp["b1"], kp["w2"], kp["b2"],
               kp["g1"], kp["be1"], kp["g2"], kp["be2"], gf, bef)

    kernel = functools.partial(encoder_layer_kernel, nhead=nhead, tq=tq,
                               apply_final_norm=apply_final_norm)
    return pl.pallas_call(
        kernel,
        out_shape=jax.ShapeDtypeStruct((B, S, D), jnp.float32),
        grid=(B, n_qt),
        in_specs=[pl.BlockSpec((1, S, D), lambda b, q: (b, 0, 0)),
                  pl.BlockSpec((1, S, D), lambda b, q: (b, 0, 0))]
                 + [_const_spec(w.shape) for w in weights],
        out_specs=pl.BlockSpec((1, tq, D), lambda b, q: (b, q, 0)),
        scratch_shapes=[pltpu.VMEM((nhead, S, D // nhead), jnp.bfloat16),
                        pltpu.VMEM((nhead, S, D // nhead), jnp.bfloat16),
                        pltpu.VMEM((nhead, S, D // nhead), jnp.bfloat16)],
        compiler_params=pltpu.CompilerParams(
            # query-tile axis is 'arbitrary': the cached K/V scratch written at
            # qi == 0 must be reused sequentially; batch axis shards on megacore.
            dimension_semantics=("parallel", "arbitrary"),
            vmem_limit_bytes=_vmem_budget(S, D, F, nhead, tq)),
    )(x, p, *weights)


def transformer_encoder(src, pos, params, nhead, q_tile=None):
    """src, pos: (S, B, D)  — PyTorch (seq, batch, d_model) convention."""
    x = jnp.transpose(src, (1, 0, 2)).astype(jnp.float32)      # (B, S, D)
    p = jnp.transpose(pos, (1, 0, 2)).astype(jnp.float32)
    B, S, D = x.shape
    tq = q_tile if q_tile is not None else _pick_tq(S)
    assert S % tq == 0, "q_tile must divide the sequence length"

    norm = params.get("norm")
    if norm is not None:
        gf = norm[0].reshape(1, D).astype(jnp.float32)
        bef = norm[1].reshape(1, D).astype(jnp.float32)
    else:
        gf = jnp.ones((1, D), jnp.float32)
        bef = jnp.zeros((1, D), jnp.float32)

    n_layers = len(params["layers"])
    for i, lp in enumerate(params["layers"]):
        kp = _prep_layer(lp, nhead)
        is_last = (i == n_layers - 1)
        x = _run_layer(x, p, kp, gf, bef, nhead, tq,
                       apply_final_norm=(is_last and norm is not None))

    return jnp.transpose(x, (1, 0, 2))                          # back to (S, B, D)


# ---------------------------------------------------------------------------
# Pure-JAX f32 reference (PyTorch semantics) for the correctness check
# ---------------------------------------------------------------------------
def _ref_layer(x, p, lp, nhead):
    S, D = x.shape
    hd = D // nhead
    qk_in = x + p
    q = qk_in @ lp["wqkv"][:D].T + lp["bqkv"][:D]
    k = qk_in @ lp["wqkv"][D:2 * D].T + lp["bqkv"][D:2 * D]
    v = x @ lp["wqkv"][2 * D:].T + lp["bqkv"][2 * D:]
    outs = []
    for h in range(nhead):
        sl = slice(h * hd, (h + 1) * hd)
        a = jax.nn.softmax((q[:, sl] / jnp.sqrt(jnp.float32(hd))) @ k[:, sl].T, axis=-1)
        outs.append(a @ v[:, sl])
    attn = jnp.concatenate(outs, axis=-1) @ lp["wo"].T + lp["bo"]
    x1 = _layernorm(x + attn, lp["g1"], lp["be1"])
    h1 = jnp.maximum(x1 @ lp["w1"].T + lp["b1"], 0.0)
    h2 = h1 @ lp["w2"].T + lp["b2"]
    return _layernorm(x1 + h2, lp["g2"], lp["be2"])


def _ref_encoder(src, pos, params, nhead):
    S, B, D = src.shape
    outs = []
    for b in range(B):
        x = src[:, b, :]
        p = pos[:, b, :]
        for lp in params["layers"]:
            x = _ref_layer(x, p, lp, nhead)
        if params.get("norm") is not None:
            g, be = params["norm"]
            x = _layernorm(x, g, be)
        outs.append(x)
    return jnp.stack(outs, axis=1)


# ---------------------------------------------------------------------------
# Deterministic parameter init (PyTorch-style layouts)
# ---------------------------------------------------------------------------
def make_params(key, num_layers, d_model, nhead, dim_ff):
    layers = []
    for _ in range(num_layers):
        keys = jax.random.split(key, 9)
        key = keys[0]
        s = 0.05
        lp = dict(
            wqkv=s * jax.random.normal(keys[1], (3 * d_model, d_model), jnp.float32),
            bqkv=s * jax.random.normal(keys[2], (3 * d_model,), jnp.float32),
            wo=s * jax.random.normal(keys[3], (d_model, d_model), jnp.float32),
            bo=s * jax.random.normal(keys[4], (d_model,), jnp.float32),
            w1=s * jax.random.normal(keys[5], (dim_ff, d_model), jnp.float32),
            b1=s * jax.random.normal(keys[6], (dim_ff,), jnp.float32),
            w2=s * jax.random.normal(keys[7], (d_model, dim_ff), jnp.float32),
            b2=s * jax.random.normal(keys[8], (d_model,), jnp.float32),
            g1=jnp.ones((d_model,), jnp.float32),
            be1=jnp.zeros((d_model,), jnp.float32),
            g2=jnp.ones((d_model,), jnp.float32),
            be2=jnp.zeros((d_model,), jnp.float32),
        )
        layers.append(lp)
    norm = (jnp.ones((d_model,), jnp.float32), jnp.zeros((d_model,), jnp.float32))
    return {"layers": layers, "norm": norm}


if __name__ == "__main__":
    S, B, D = 32, 2, 128                 # seq, batch, d_model
    NHEAD, DIM_FF, N_LAYERS = 4, 256, 2  # head_dim = 32

    root = jax.random.PRNGKey(0)
    k_src, k_pos, k_par = jax.random.split(root, 3)
    src = jax.random.normal(k_src, (S, B, D), jnp.float32)
    pos = jax.random.normal(k_pos, (S, B, D), jnp.float32)
    params = make_params(k_par, N_LAYERS, D, NHEAD, DIM_FF)

    # q_tile=16 -> 2 query tiles per batch element, exercising the cached-K/V path.
    out = transformer_encoder(src, pos, params, NHEAD, q_tile=16)
    out = jax.block_until_ready(out)
    assert out.shape == (S, B, D)

    # Compare against the pure-f32 reference; tolerance accounts for bf16 MXU
    # inputs (f32 accumulation) and the EUP approximate reciprocal in softmax.
    ref = _ref_encoder(src, pos, params, NHEAD)
    max_err = float(jnp.max(jnp.abs(out - ref)))
    rel_l2 = float(jnp.linalg.norm(out - ref) / jnp.linalg.norm(ref))
    assert rel_l2 < 3e-2 and max_err < 1.5e-1, (
        f"mismatch vs reference: rel_l2={rel_l2:.4f} max_abs={max_err:.4f}")

    print("KERNEL_OK")
</pallas_src>

<mosaic_0001>
module attributes {stable_mosaic.version = 11 : i64} {
  func.func @encoder_layer_kernel(%arg0: i32, %arg1: i32, %arg2: memref<1x32x128xf32, #tpu.memory_space<vmem>>, %arg3: memref<1x32x128xf32, #tpu.memory_space<vmem>>, %arg4: memref<128x256xbf16, #tpu.memory_space<vmem>>, %arg5: memref<1x256xf32, #tpu.memory_space<vmem>>, %arg6: memref<128x128xbf16, #tpu.memory_space<vmem>>, %arg7: memref<1x128xf32, #tpu.memory_space<vmem>>, %arg8: memref<4x32x128xbf16, #tpu.memory_space<vmem>>, %arg9: memref<1x128xf32, #tpu.memory_space<vmem>>, %arg10: memref<128x256xbf16, #tpu.memory_space<vmem>>, %arg11: memref<1x256xf32, #tpu.memory_space<vmem>>, %arg12: memref<256x128xbf16, #tpu.memory_space<vmem>>, %arg13: memref<1x128xf32, #tpu.memory_space<vmem>>, %arg14: memref<1x128xf32, #tpu.memory_space<vmem>>, %arg15: memref<1x128xf32, #tpu.memory_space<vmem>>, %arg16: memref<1x128xf32, #tpu.memory_space<vmem>>, %arg17: memref<1x128xf32, #tpu.memory_space<vmem>>, %arg18: memref<1x128xf32, #tpu.memory_space<vmem>>, %arg19: memref<1x128xf32, #tpu.memory_space<vmem>>, %arg20: memref<1x16x128xf32, #tpu.memory_space<vmem>>, %arg21: memref<4x32x32xbf16, #tpu.memory_space<vmem>>, %arg22: memref<4x32x32xbf16, #tpu.memory_space<vmem>>, %arg23: memref<4x32x32xbf16, #tpu.memory_space<vmem>>) attributes {dimension_semantics = [#tpu.dimension_semantics<parallel>, #tpu.dimension_semantics<arbitrary>], iteration_bounds = array<i64: 2, 2>, scalar_prefetch = 0 : i64, scratch_operands = 3 : i64, tpu.core_type = #tpu.core_type<tc>, window_params = [{transform_indices = @transform_0, window_bounds = array<i64: 1, 32, 128>}, {transform_indices = @transform_1, window_bounds = array<i64: 1, 32, 128>}, {pipeline_mode = #tpu.pipeline_mode<synchronous>, transform_indices = @transform_2, window_bounds = array<i64: 128, 256>}, {pipeline_mode = #tpu.pipeline_mode<synchronous>, transform_indices = @transform_3, window_bounds = array<i64: 1, 256>}, {pipeline_mode = #tpu.pipeline_mode<synchronous>, transform_indices = @transform_4, window_bounds = array<i64: 128, 128>}, {pipeline_mode = #tpu.pipeline_mode<synchronous>, transform_indices = @transform_5, window_bounds = array<i64: 1, 128>}, {pipeline_mode = #tpu.pipeline_mode<synchronous>, transform_indices = @transform_6, window_bounds = array<i64: 4, 32, 128>}, {pipeline_mode = #tpu.pipeline_mode<synchronous>, transform_indices = @transform_7, window_bounds = array<i64: 1, 128>}, {pipeline_mode = #tpu.pipeline_mode<synchronous>, transform_indices = @transform_8, window_bounds = array<i64: 128, 256>}, {pipeline_mode = #tpu.pipeline_mode<synchronous>, transform_indices = @transform_9, window_bounds = array<i64: 1, 256>}, {pipeline_mode = #tpu.pipeline_mode<synchronous>, transform_indices = @transform_10, window_bounds = array<i64: 256, 128>}, {pipeline_mode = #tpu.pipeline_mode<synchronous>, transform_indices = @transform_11, window_bounds = array<i64: 1, 128>}, {pipeline_mode = #tpu.pipeline_mode<synchronous>, transform_indices = @transform_12, window_bounds = array<i64: 1, 128>}, {pipeline_mode = #tpu.pipeline_mode<synchronous>, transform_indices = @transform_13, window_bounds = array<i64: 1, 128>}, {pipeline_mode = #tpu.pipeline_mode<synchronous>, transform_indices = @transform_14, window_bounds = array<i64: 1, 128>}, {pipeline_mode = #tpu.pipeline_mode<synchronous>, transform_indices = @transform_15, window_bounds = array<i64: 1, 128>}, {pipeline_mode = #tpu.pipeline_mode<synchronous>, transform_indices = @transform_16, window_bounds = array<i64: 1, 128>}, {pipeline_mode = #tpu.pipeline_mode<synchronous>, transform_indices = @transform_17, window_bounds = array<i64: 1, 128>}, {transform_indices = @transform_18, window_bounds = array<i64: 1, 16, 128>}]} {
    %c0_i32 = arith.constant 0 : i32
    %0 = arith.cmpi eq, %arg1, %c0_i32 : i32
    %1 = arith.extui %0 : i1 to i32
    %c0_i32_0 = arith.constant 0 : i32
    %2 = arith.cmpi ne, %1, %c0_i32_0 : i32
    scf.if %2 {
      %c0_52 = arith.constant 0 : index
      %c0_53 = arith.constant 0 : index
      %c0_54 = arith.constant 0 : index
      %113 = vector.load %arg2[%c0_52, %c0_53, %c0_54] : memref<1x32x128xf32, #tpu.memory_space<vmem>>, vector<1x32x128xf32>
      %114 = vector.shape_cast %113 : vector<1x32x128xf32> to vector<32x128xf32>
      %c0_55 = arith.constant 0 : index
      %c0_56 = arith.constant 0 : index
      %c0_57 = arith.constant 0 : index
      %115 = vector.load %arg3[%c0_55, %c0_56, %c0_57] : memref<1x32x128xf32, #tpu.memory_space<vmem>>, vector<1x32x128xf32>
      %116 = vector.shape_cast %115 : vector<1x32x128xf32> to vector<32x128xf32>
      %117 = arith.addf %114, %116 : vector<32x128xf32>
      %118 = arith.truncf %117 : vector<32x128xf32> to vector<32x128xbf16>
      %c0_58 = arith.constant 0 : index
      %c0_59 = arith.constant 0 : index
      %119 = vector.load %arg4[%c0_58, %c0_59] : memref<128x256xbf16, #tpu.memory_space<vmem>>, vector<128x256xbf16>
      %cst_60 = arith.constant dense<0.000000e+00> : vector<32x256xf32>
      %120 = tpu.matmul %118, %119, %cst_60 {dimension_numbers = #tpu.dot_dimension_numbers<[1], [0], [0], [1], [0, 0, 1, 1], [], []>} : vector<32x128xbf16>, vector<128x256xbf16>, vector<32x256xf32> -> vector<32x256xf32>
      %c0_61 = arith.constant 0 : index
      %c0_62 = arith.constant 0 : index
      %121 = vector.load %arg5[%c0_61, %c0_62] : memref<1x256xf32, #tpu.memory_space<vmem>>, vector<1x256xf32>
      %122 = vector.shape_cast %121 : vector<1x256xf32> to vector<256xf32>
      %123 = vector.shape_cast %122 : vector<256xf32> to vector<1x256xf32>
      %124 = vector.broadcast %123 : vector<1x256xf32> to vector<32x256xf32>
      %125 = arith.addf %120, %124 : vector<32x256xf32>
      %126 = arith.truncf %114 : vector<32x128xf32> to vector<32x128xbf16>
      %c0_63 = arith.constant 0 : index
      %c0_64 = arith.constant 0 : index
      %127 = vector.load %arg6[%c0_63, %c0_64] : memref<128x128xbf16, #tpu.memory_space<vmem>>, vector<128x128xbf16>
      %cst_65 = arith.constant dense<0.000000e+00> : vector<32x128xf32>
      %128 = tpu.matmul %126, %127, %cst_65 {dimension_numbers = #tpu.dot_dimension_numbers<[1], [0], [0], [1], [0, 0, 1, 1], [], []>} : vector<32x128xbf16>, vector<128x128xbf16>, vector<32x128xf32> -> vector<32x128xf32>
      %c0_66 = arith.constant 0 : index
      %c0_67 = arith.constant 0 : index
      %129 = vector.load %arg7[%c0_66, %c0_67] : memref<1x128xf32, #tpu.memory_space<vmem>>, vector<1x128xf32>
      %130 = vector.shape_cast %129 : vector<1x128xf32> to vector<128xf32>
      %131 = vector.shape_cast %130 : vector<128xf32> to vector<1x128xf32>
      %132 = vector.broadcast %131 : vector<1x128xf32> to vector<32x128xf32>
      %133 = arith.addf %128, %132 : vector<32x128xf32>
      %134 = vector.extract_strided_slice %125 {offsets = [0, 0], sizes = [32, 128], strides = [1, 1]} : vector<32x256xf32> to vector<32x128xf32>
      %cst_68 = arith.constant 0.176776692 : f32
      %135 = vector.broadcast %cst_68 : f32 to vector<32x128xf32>
      %136 = arith.mulf %134, %135 : vector<32x128xf32>
      %137 = vector.extract_strided_slice %125 {offsets = [0, 128], sizes = [32, 128], strides = [1, 1]} : vector<32x256xf32> to vector<32x128xf32>
      %138 = vector.extract_strided_slice %136 {offsets = [0, 0], sizes = [32, 32], strides = [1, 1]} : vector<32x128xf32> to vector<32x32xf32>
      %139 = arith.truncf %138 : vector<32x32xf32> to vector<32x32xbf16>
      %c0_69 = arith.constant 0 : index
      %c0_70 = arith.constant 0 : index
      %c0_71 = arith.constant 0 : index
      %140 = vector.load %arg21[%c0_69, %c0_70, %c0_71] : memref<4x32x32xbf16, #tpu.memory_space<vmem>>, vector<1x32x32xbf16>
      %141 = vector.shape_cast %140 : vector<1x32x32xbf16> to vector<32x32xbf16>
      %142 = vector.shape_cast %139 : vector<32x32xbf16> to vector<1x32x32xbf16>
      tpu.vector_store %arg21[%c0_69, %c0_70, %c0_71], %142 {strides = array<i32>} : memref<4x32x32xbf16, #tpu.memory_space<vmem>>, vector<1x32x32xbf16>,
      %143 = vector.extract_strided_slice %137 {offsets = [0, 0], sizes = [32, 32], strides = [1, 1]} : vector<32x128xf32> to vector<32x32xf32>
      %144 = arith.truncf %143 : vector<32x32xf32> to vector<32x32xbf16>
      %c0_72 = arith.constant 0 : index
      %c0_73 = arith.constant 0 : index
      %c0_74 = arith.constant 0 : index
      %145 = vector.load %arg22[%c0_72, %c0_73, %c0_74] : memref<4x32x32xbf16, #tpu.memory_space<vmem>>, vector<1x32x32xbf16>
      %146 = vector.shape_cast %145 : vector<1x32x32xbf16> to vector<32x32xbf16>
      %147 = vector.shape_cast %144 : vector<32x32xbf16> to vector<1x32x32xbf16>
      tpu.vector_store %arg22[%c0_72, %c0_73, %c0_74], %147 {strides = array<i32>} : memref<4x32x32xbf16, #tpu.memory_space<vmem>>, vector<1x32x32xbf16>,
      %148 = vector.extract_strided_slice %133 {offsets = [0, 0], sizes = [32, 32], strides = [1, 1]} : vector<32x128xf32> to vector<32x32xf32>
      %149 = arith.truncf %148 : vector<32x32xf32> to vector<32x32xbf16>
      %c0_75 = arith.constant 0 : index
      %c0_76 = arith.constant 0 : index
      %c0_77 = arith.constant 0 : index
      %150 = vector.load %arg23[%c0_75, %c0_76, %c0_77] : memref<4x32x32xbf16, #tpu.memory_space<vmem>>, vector<1x32x32xbf16>
      %151 = vector.shape_cast %150 : vector<1x32x32xbf16> to vector<32x32xbf16>
      %152 = vector.shape_cast %149 : vector<32x32xbf16> to vector<1x32x32xbf16>
      tpu.vector_store %arg23[%c0_75, %c0_76, %c0_77], %152 {strides = array<i32>} : memref<4x32x32xbf16, #tpu.memory_space<vmem>>, vector<1x32x32xbf16>,
      %153 = vector.extract_strided_slice %136 {offsets = [0, 32], sizes = [32, 32], strides = [1, 1]} : vector<32x128xf32> to vector<32x32xf32>
      %154 = arith.truncf %153 : vector<32x32xf32> to vector<32x32xbf16>
      %c1 = arith.constant 1 : index
      %c0_78 = arith.constant 0 : index
      %c0_79 = arith.constant 0 : index
      %155 = vector.load %arg21[%c1, %c0_78, %c0_79] : memref<4x32x32xbf16, #tpu.memory_space<vmem>>, vector<1x32x32xbf16>
      %156 = vector.shape_cast %155 : vector<1x32x32xbf16> to vector<32x32xbf16>
      %157 = vector.shape_cast %154 : vector<32x32xbf16> to vector<1x32x32xbf16>
      tpu.vector_store %arg21[%c1, %c0_78, %c0_79], %157 {strides = array<i32>} : memref<4x32x32xbf16, #tpu.memory_space<vmem>>, vector<1x32x32xbf16>,
      %158 = vector.extract_strided_slice %137 {offsets = [0, 32], sizes = [32, 32], strides = [1, 1]} : vector<32x128xf32> to vector<32x32xf32>
      %159 = arith.truncf %158 : vector<32x32xf32> to vector<32x32xbf16>
      %c1_80 = arith.constant 1 : index
      %c0_81 = arith.constant 0 : index
      %c0_82 = arith.constant 0 : index
      %160 = vector.load %arg22[%c1_80, %c0_81, %c0_82] : memref<4x32x32xbf16, #tpu.memory_space<vmem>>, vector<1x32x32xbf16>
      %161 = vector.shape_cast %160 : vector<1x32x32xbf16> to vector<32x32xbf16>
      %162 = vector.shape_cast %159 : vector<32x32xbf16> to vector<1x32x32xbf16>
      tpu.vector_store %arg22[%c1_80, %c0_81, %c0_82], %162 {strides = array<i32>} : memref<4x32x32xbf16, #tpu.memory_space<vmem>>, vector<1x32x32xbf16>,
      %163 = vector.extract_strided_slice %133 {offsets = [0, 32], sizes = [32, 32], strides = [1, 1]} : vector<32x128xf32> to vector<32x32xf32>
      %164 = arith.truncf %163 : vector<32x32xf32> to vector<32x32xbf16>
      %c1_83 = arith.constant 1 : index
      %c0_84 = arith.constant 0 : index
      %c0_85 = arith.constant 0 : index
      %165 = vector.load %arg23[%c1_83, %c0_84, %c0_85] : memref<4x32x32xbf16, #tpu.memory_space<vmem>>, vector<1x32x32xbf16>
      %166 = vector.shape_cast %165 : vector<1x32x32xbf16> to vector<32x32xbf16>
      %167 = vector.shape_cast %164 : vector<32x32xbf16> to vector<1x32x32xbf16>
      tpu.vector_store %arg23[%c1_83, %c0_84, %c0_85], %167 {strides = array<i32>} : memref<4x32x32xbf16, #tpu.memory_space<vmem>>, vector<1x32x32xbf16>,
      %168 = vector.extract_strided_slice %136 {offsets = [0, 64], sizes = [32, 32], strides = [1, 1]} : vector<32x128xf32> to vector<32x32xf32>
      %169 = arith.truncf %168 : vector<32x32xf32> to vector<32x32xbf16>
      %c2 = arith.constant 2 : index
      %c0_86 = arith.constant 0 : index
      %c0_87 = arith.constant 0 : index
      %170 = vector.load %arg21[%c2, %c0_86, %c0_87] : memref<4x32x32xbf16, #tpu.memory_space<vmem>>, vector<1x32x32xbf16>
      %171 = vector.shape_cast %170 : vector<1x32x32xbf16> to vector<32x32xbf16>
      %172 = vector.shape_cast %169 : vector<32x32xbf16> to vector<1x32x32xbf16>
      tpu.vector_store %arg21[%c2, %c0_86, %c0_87], %172 {strides = array<i32>} : memref<4x32x32xbf16, #tpu.memory_space<vmem>>, vector<1x32x32xbf16>,
      %173 = vector.extract_strided_slice %137 {offsets = [0, 64], sizes = [32, 32], strides = [1, 1]} : vector<32x128xf32> to vector<32x32xf32>
      %174 = arith.truncf %173 : vector<32x32xf32> to vector<32x32xbf16>
      %c2_88 = arith.constant 2 : index
      %c0_89 = arith.constant 0 : index
      %c0_90 = arith.constant 0 : index
      %175 = vector.load %arg22[%c2_88, %c0_89, %c0_90] : memref<4x32x32xbf16, #tpu.memory_space<vmem>>, vector<1x32x32xbf16>
      %176 = vector.shape_cast %175 : vector<1x32x32xbf16> to vector<32x32xbf16>
      %177 = vector.shape_cast %174 : vector<32x32xbf16> to vector<1x32x32xbf16>
      tpu.vector_store %arg22[%c2_88, %c0_89, %c0_90], %177 {strides = array<i32>} : memref<4x32x32xbf16, #tpu.memory_space<vmem>>, vector<1x32x32xbf16>,
      %178 = vector.extract_strided_slice %133 {offsets = [0, 64], sizes = [32, 32], strides = [1, 1]} : vector<32x128xf32> to vector<32x32xf32>
      %179 = arith.truncf %178 : vector<32x32xf32> to vector<32x32xbf16>
      %c2_91 = arith.constant 2 : index
      %c0_92 = arith.constant 0 : index
      %c0_93 = arith.constant 0 : index
      %180 = vector.load %arg23[%c2_91, %c0_92, %c0_93] : memref<4x32x32xbf16, #tpu.memory_space<vmem>>, vector<1x32x32xbf16>
      %181 = vector.shape_cast %180 : vector<1x32x32xbf16> to vector<32x32xbf16>
      %182 = vector.shape_cast %179 : vector<32x32xbf16> to vector<1x32x32xbf16>
      tpu.vector_store %arg23[%c2_91, %c0_92, %c0_93], %182 {strides = array<i32>} : memref<4x32x32xbf16, #tpu.memory_space<vmem>>, vector<1x32x32xbf16>,
      %183 = vector.extract_strided_slice %136 {offsets = [0, 96], sizes = [32, 32], strides = [1, 1]} : vector<32x128xf32> to vector<32x32xf32>
      %184 = arith.truncf %183 : vector<32x32xf32> to vector<32x32xbf16>
      %c3 = arith.constant 3 : index
      %c0_94 = arith.constant 0 : index
      %c0_95 = arith.constant 0 : index
      %185 = vector.load %arg21[%c3, %c0_94, %c0_95] : memref<4x32x32xbf16, #tpu.memory_space<vmem>>, vector<1x32x32xbf16>
      %186 = vector.shape_cast %185 : vector<1x32x32xbf16> to vector<32x32xbf16>
      %187 = vector.shape_cast %184 : vector<32x32xbf16> to vector<1x32x32xbf16>
      tpu.vector_store %arg21[%c3, %c0_94, %c0_95], %187 {strides = array<i32>} : memref<4x32x32xbf16, #tpu.memory_space<vmem>>, vector<1x32x32xbf16>,
      %188 = vector.extract_strided_slice %137 {offsets = [0, 96], sizes = [32, 32], strides = [1, 1]} : vector<32x128xf32> to vector<32x32xf32>
      %189 = arith.truncf %188 : vector<32x32xf32> to vector<32x32xbf16>
      %c3_96 = arith.constant 3 : index
      %c0_97 = arith.constant 0 : index
      %c0_98 = arith.constant 0 : index
      %190 = vector.load %arg22[%c3_96, %c0_97, %c0_98] : memref<4x32x32xbf16, #tpu.memory_space<vmem>>, vector<1x32x32xbf16>
      %191 = vector.shape_cast %190 : vector<1x32x32xbf16> to vector<32x32xbf16>
      %192 = vector.shape_cast %189 : vector<32x32xbf16> to vector<1x32x32xbf16>
      tpu.vector_store %arg22[%c3_96, %c0_97, %c0_98], %192 {strides = array<i32>} : memref<4x32x32xbf16, #tpu.memory_space<vmem>>, vector<1x32x32xbf16>,
      %193 = vector.extract_strided_slice %133 {offsets = [0, 96], sizes = [32, 32], strides = [1, 1]} : vector<32x128xf32> to vector<32x32xf32>
      %194 = arith.truncf %193 : vector<32x32xf32> to vector<32x32xbf16>
      %c3_99 = arith.constant 3 : index
      %c0_100 = arith.constant 0 : index
      %c0_101 = arith.constant 0 : index
      %195 = vector.load %arg23[%c3_99, %c0_100, %c0_101] : memref<4x32x32xbf16, #tpu.memory_space<vmem>>, vector<1x32x32xbf16>
      %196 = vector.shape_cast %195 : vector<1x32x32xbf16> to vector<32x32xbf16>
      %197 = vector.shape_cast %194 : vector<32x32xbf16> to vector<1x32x32xbf16>
      tpu.vector_store %arg23[%c3_99, %c0_100, %c0_101], %197 {strides = array<i32>} : memref<4x32x32xbf16, #tpu.memory_space<vmem>>, vector<1x32x32xbf16>,
    } else {
    }
    %c16_i32 = arith.constant 16 : i32
    %3 = arith.muli %arg1, %c16_i32 : i32
    %4 = tpu.assume_multiple %3, 16 : i32
    %c0 = arith.constant 0 : index
    %5 = arith.index_cast %4 : i32 to index
    %c0_1 = arith.constant 0 : index
    %6 = vector.load %arg21[%c0, %5, %c0_1] : memref<4x32x32xbf16, #tpu.memory_space<vmem>>, vector<4x16x32xbf16>
    %c0_2 = arith.constant 0 : index
    %c0_3 = arith.constant 0 : index
    %c0_4 = arith.constant 0 : index
    %7 = vector.load %arg22[%c0_2, %c0_3, %c0_4] : memref<4x32x32xbf16, #tpu.memory_space<vmem>>, vector<4x32x32xbf16>
    %c0_5 = arith.constant 0 : index
    %c0_6 = arith.constant 0 : index
    %c0_7 = arith.constant 0 : index
    %8 = vector.load %arg23[%c0_5, %c0_6, %c0_7] : memref<4x32x32xbf16, #tpu.memory_space<vmem>>, vector<4x32x32xbf16>
    %cst = arith.constant dense<0.000000e+00> : vector<4x16x32xf32>
    %9 = tpu.matmul %6, %7, %cst {dimension_numbers = #tpu.dot_dimension_numbers<[2], [2], [1], [1], [0, 0, 0, 1, 1, 1], [0], [0]>} : vector<4x16x32xbf16>, vector<4x32x32xbf16>, vector<4x16x32xf32> -> vector<4x16x32xf32>
    %cst_8 = arith.constant dense<0xFF800000> : vector<4x16xf32>
    %10 = vector.multi_reduction <maximumf>, %9, %cst_8 [2] : vector<4x16x32xf32> to vector<4x16xf32>
    %11 = vector.shape_cast %10 : vector<4x16xf32> to vector<4x16x1xf32>
    %12 = vector.broadcast %11 : vector<4x16x1xf32> to vector<4x16x32xf32>
    %13 = arith.subf %9, %12 : vector<4x16x32xf32>
    %14 = math.exp %13 : vector<4x16x32xf32>
    %cst_9 = arith.constant dense<0.000000e+00> : vector<4x16xf32>
    %15 = vector.multi_reduction <add>, %14, %cst_9 [2] : vector<4x16x32xf32> to vector<4x16xf32>
    %16 = vector.shape_cast %15 : vector<4x16xf32> to vector<4x16x1xf32>
    %17 = tpu.reciprocal %16 {approx = true} : vector<4x16x1xf32> -> vector<4x16x1xf32>
    %18 = vector.broadcast %17 : vector<4x16x1xf32> to vector<4x16x32xf32>
    %19 = arith.mulf %14, %18 : vector<4x16x32xf32>
    %20 = arith.truncf %19 : vector<4x16x32xf32> to vector<4x16x32xbf16>
    %cst_10 = arith.constant dense<0.000000e+00> : vector<4x16x32xf32>
    %21 = tpu.matmul %20, %8, %cst_10 {dimension_numbers = #tpu.dot_dimension_numbers<[2], [1], [1], [2], [0, 0, 0, 1, 1, 2], [0], [0]>} : vector<4x16x32xbf16>, vector<4x32x32xbf16>, vector<4x16x32xf32> -> vector<4x16x32xf32>
    %22 = arith.truncf %21 : vector<4x16x32xf32> to vector<4x16x32xbf16>
    %c0_11 = arith.constant 0 : index
    %c0_12 = arith.constant 0 : index
    %c0_13 = arith.constant 0 : index
    %23 = vector.load %arg8[%c0_11, %c0_12, %c0_13] : memref<4x32x128xbf16, #tpu.memory_space<vmem>>, vector<4x32x128xbf16>
    %cst_14 = arith.constant dense<0.000000e+00> : vector<4x16x128xf32>
    %24 = tpu.matmul %22, %23, %cst_14 {dimension_numbers = #tpu.dot_dimension_numbers<[2], [1], [1], [2], [0, 0, 0, 1, 1, 2], [0], [0]>} : vector<4x16x32xbf16>, vector<4x32x128xbf16>, vector<4x16x128xf32> -> vector<4x16x128xf32>
    %cst_15 = arith.constant dense<0.000000e+00> : vector<16x128xf32>
    %25 = vector.multi_reduction <add>, %24, %cst_15 [0] : vector<4x16x128xf32> to vector<16x128xf32>
    %c0_16 = arith.constant 0 : index
    %c0_17 = arith.constant 0 : index
    %26 = vector.load %arg9[%c0_16, %c0_17] : memref<1x128xf32, #tpu.memory_space<vmem>>, vector<1x128xf32>
    %27 = vector.shape_cast %26 : vector<1x128xf32> to vector<128xf32>
    %28 = vector.shape_cast %27 : vector<128xf32> to vector<1x128xf32>
    %29 = vector.broadcast %28 : vector<1x128xf32> to vector<16x128xf32>
    %30 = arith.addf %25, %29 : vector<16x128xf32>
    %c0_18 = arith.constant 0 : index
    %31 = arith.index_cast %4 : i32 to index
    %c0_19 = arith.constant 0 : index
    %32 = vector.load %arg2[%c0_18, %31, %c0_19] : memref<1x32x128xf32, #tpu.memory_space<vmem>>, vector<1x16x128xf32>
    %33 = vector.shape_cast %32 : vector<1x16x128xf32> to vector<16x128xf32>
    %34 = arith.addf %33, %30 : vector<16x128xf32>
    %c0_20 = arith.constant 0 : index
    %c0_21 = arith.constant 0 : index
    %35 = vector.load %arg14[%c0_20, %c0_21] : memref<1x128xf32, #tpu.memory_space<vmem>>, vector<1x128xf32>
    %36 = vector.shape_cast %35 : vector<1x128xf32> to vector<128xf32>
    %c0_22 = arith.constant 0 : index
    %c0_23 = arith.constant 0 : index
    %37 = vector.load %arg15[%c0_22, %c0_23] : memref<1x128xf32, #tpu.memory_space<vmem>>, vector<1x128xf32>
    %38 = vector.shape_cast %37 : vector<1x128xf32> to vector<128xf32>
    %cst_24 = arith.constant dense<0.000000e+00> : vector<16xf32>
    %39 = vector.multi_reduction <add>, %34, %cst_24 [1] : vector<16x128xf32> to vector<16xf32>
    %40 = vector.shape_cast %39 : vector<16xf32> to vector<16x1xf32>
    %cst_25 = arith.constant 1.280000e+02 : f32
    %41 = vector.broadcast %cst_25 : f32 to vector<16x1xf32>
    %42 = arith.divf %40, %41 : vector<16x1xf32>
    %43 = vector.broadcast %42 : vector<16x1xf32> to vector<16x128xf32>
    %44 = arith.subf %34, %43 : vector<16x128xf32>
    %45 = arith.mulf %44, %44 : vector<16x128xf32>
    %cst_26 = arith.constant dense<0.000000e+00> : vector<16xf32>
    %46 = vector.multi_reduction <add>, %45, %cst_26 [1] : vector<16x128xf32> to vector<16xf32>
    %47 = vector.shape_cast %46 : vector<16xf32> to vector<16x1xf32>
    %cst_27 = arith.constant 1.280000e+02 : f32
    %48 = vector.broadcast %cst_27 : f32 to vector<16x1xf32>
    %49 = arith.divf %47, %48 : vector<16x1xf32>
    %50 = vector.broadcast %42 : vector<16x1xf32> to vector<16x128xf32>
    %51 = arith.subf %34, %50 : vector<16x128xf32>
    %cst_28 = arith.constant 9.99999974E-6 : f32
    %52 = vector.broadcast %cst_28 : f32 to vector<16x1xf32>
    %53 = arith.addf %49, %52 : vector<16x1xf32>
    %54 = math.rsqrt %53 : vector<16x1xf32>
    %55 = vector.broadcast %54 : vector<16x1xf32> to vector<16x128xf32>
    %56 = arith.mulf %51, %55 : vector<16x128xf32>
    %57 = vector.shape_cast %36 : vector<128xf32> to vector<1x128xf32>
    %58 = vector.broadcast %57 : vector<1x128xf32> to vector<16x128xf32>
    %59 = arith.mulf %56, %58 : vector<16x128xf32>
    %60 = vector.shape_cast %38 : vector<128xf32> to vector<1x128xf32>
    %61 = vector.broadcast %60 : vector<1x128xf32> to vector<16x128xf32>
    %62 = arith.addf %59, %61 : vector<16x128xf32>
    %63 = arith.truncf %62 : vector<16x128xf32> to vector<16x128xbf16>
    %c0_29 = arith.constant 0 : index
    %c0_30 = arith.constant 0 : index
    %64 = vector.load %arg10[%c0_29, %c0_30] : memref<128x256xbf16, #tpu.memory_space<vmem>>, vector<128x256xbf16>
    %cst_31 = arith.constant dense<0.000000e+00> : vector<16x256xf32>
    %65 = tpu.matmul %63, %64, %cst_31 {dimension_numbers = #tpu.dot_dimension_numbers<[1], [0], [0], [1], [0, 0, 1, 1], [], []>} : vector<16x128xbf16>, vector<128x256xbf16>, vector<16x256xf32> -> vector<16x256xf32>
    %c0_32 = arith.constant 0 : index
    %c0_33 = arith.constant 0 : index
    %66 = vector.load %arg11[%c0_32, %c0_33] : memref<1x256xf32, #tpu.memory_space<vmem>>, vector<1x256xf32>
    %67 = vector.shape_cast %66 : vector<1x256xf32> to vector<256xf32>
    %68 = vector.shape_cast %67 : vector<256xf32> to vector<1x256xf32>
    %69 = vector.broadcast %68 : vector<1x256xf32> to vector<16x256xf32>
    %70 = arith.addf %65, %69 : vector<16x256xf32>
    %cst_34 = arith.constant 0.000000e+00 : f32
    %71 = vector.broadcast %cst_34 : f32 to vector<16x256xf32>
    %72 = arith.maximumf %70, %71 : vector<16x256xf32>
    %73 = arith.truncf %72 : vector<16x256xf32> to vector<16x256xbf16>
    %c0_35 = arith.constant 0 : index
    %c0_36 = arith.constant 0 : index
    %74 = vector.load %arg12[%c0_35, %c0_36] : memref<256x128xbf16, #tpu.memory_space<vmem>>, vector<256x128xbf16>
    %cst_37 = arith.constant dense<0.000000e+00> : vector<16x128xf32>
    %75 = tpu.matmul %73, %74, %cst_37 {dimension_numbers = #tpu.dot_dimension_numbers<[1], [0], [0], [1], [0, 0, 1, 1], [], []>} : vector<16x256xbf16>, vector<256x128xbf16>, vector<16x128xf32> -> vector<16x128xf32>
    %c0_38 = arith.constant 0 : index
    %c0_39 = arith.constant 0 : index
    %76 = vector.load %arg13[%c0_38, %c0_39] : memref<1x128xf32, #tpu.memory_space<vmem>>, vector<1x128xf32>
    %77 = vector.shape_cast %76 : vector<1x128xf32> to vector<128xf32>
    %78 = vector.shape_cast %77 : vector<128xf32> to vector<1x128xf32>
    %79 = vector.broadcast %78 : vector<1x128xf32> to vector<16x128xf32>
    %80 = arith.addf %75, %79 : vector<16x128xf32>
    %81 = arith.addf %62, %80 : vector<16x128xf32>
    %c0_40 = arith.constant 0 : index
    %c0_41 = arith.constant 0 : index
    %82 = vector.load %arg16[%c0_40, %c0_41] : memref<1x128xf32, #tpu.memory_space<vmem>>, vector<1x128xf32>
    %83 = vector.shape_cast %82 : vector<1x128xf32> to vector<128xf32>
    %c0_42 = arith.constant 0 : index
    %c0_43 = arith.constant 0 : index
    %84 = vector.load %arg17[%c0_42, %c0_43] : memref<1x128xf32, #tpu.memory_space<vmem>>, vector<1x128xf32>
    %85 = vector.shape_cast %84 : vector<1x128xf32> to vector<128xf32>
    %cst_44 = arith.constant dense<0.000000e+00> : vector<16xf32>
    %86 = vector.multi_reduction <add>, %81, %cst_44 [1] : vector<16x128xf32> to vector<16xf32>
    %87 = vector.shape_cast %86 : vector<16xf32> to vector<16x1xf32>
    %cst_45 = arith.constant 1.280000e+02 : f32
    %88 = vector.broadcast %cst_45 : f32 to vector<16x1xf32>
    %89 = arith.divf %87, %88 : vector<16x1xf32>
    %90 = vector.broadcast %89 : vector<16x1xf32> to vector<16x128xf32>
    %91 = arith.subf %81, %90 : vector<16x128xf32>
    %92 = arith.mulf %91, %91 : vector<16x128xf32>
    %cst_46 = arith.constant dense<0.000000e+00> : vector<16xf32>
    %93 = vector.multi_reduction <add>, %92, %cst_46 [1] : vector<16x128xf32> to vector<16xf32>
    %94 = vector.shape_cast %93 : vector<16xf32> to vector<16x1xf32>
    %cst_47 = arith.constant 1.280000e+02 : f32
    %95 = vector.broadcast %cst_47 : f32 to vector<16x1xf32>
    %96 = arith.divf %94, %95 : vector<16x1xf32>
    %97 = vector.broadcast %89 : vector<16x1xf32> to vector<16x128xf32>
    %98 = arith.subf %81, %97 : vector<16x128xf32>
    %cst_48 = arith.constant 9.99999974E-6 : f32
    %99 = vector.broadcast %cst_48 : f32 to vector<16x1xf32>
    %100 = arith.addf %96, %99 : vector<16x1xf32>
    %101 = math.rsqrt %100 : vector<16x1xf32>
    %102 = vector.broadcast %101 : vector<16x1xf32> to vector<16x128xf32>
    %103 = arith.mulf %98, %102 : vector<16x128xf32>
    %104 = vector.shape_cast %83 : vector<128xf32> to vector<1x128xf32>
    %105 = vector.broadcast %104 : vector<1x128xf32> to vector<16x128xf32>
    %106 = arith.mulf %103, %105 : vector<16x128xf32>
    %107 = vector.shape_cast %85 : vector<128xf32> to vector<1x128xf32>
    %108 = vector.broadcast %107 : vector<1x128xf32> to vector<16x128xf32>
    %109 = arith.addf %106, %108 : vector<16x128xf32>
    %c0_49 = arith.constant 0 : index
    %c0_50 = arith.constant 0 : index
    %c0_51 = arith.constant 0 : index
    %110 = vector.load %arg20[%c0_49, %c0_50, %c0_51] : memref<1x16x128xf32, #tpu.memory_space<vmem>>, vector<1x16x128xf32>
    %111 = vector.shape_cast %110 : vector<1x16x128xf32> to vector<16x128xf32>
    %112 = vector.shape_cast %109 : vector<16x128xf32> to vector<1x16x128xf32>
    tpu.vector_store %arg20[%c0_49, %c0_50, %c0_51], %112 {strides = array<i32>} : memref<1x16x128xf32, #tpu.memory_space<vmem>>, vector<1x16x128xf32>,
    return
  }
  func.func @transform_0(%arg0: i32, %arg1: i32) -> (i32, i32, i32) {
    %c0_i32 = arith.constant 0 : i32
    %c0_i32_0 = arith.constant 0 : i32
    %c0_i32_1 = arith.constant 0 : i32
    return %arg0, %c0_i32, %c0_i32_0 : i32, i32, i32
  }
  func.func @transform_1(%arg0: i32, %arg1: i32) -> (i32, i32, i32) {
    %c0_i32 = arith.constant 0 : i32
    %c0_i32_0 = arith.constant 0 : i32
    %c0_i32_1 = arith.constant 0 : i32
    return %arg0, %c0_i32, %c0_i32_0 : i32, i32, i32
  }
  func.func @transform_2(%arg0: i32, %arg1: i32) -> (i32, i32) {
    %c0_i32 = arith.constant 0 : i32
    %c0_i32_0 = arith.constant 0 : i32
    %c0_i32_1 = arith.constant 0 : i32
    return %c0_i32, %c0_i32_0 : i32, i32
  }
  func.func @transform_3(%arg0: i32, %arg1: i32) -> (i32, i32) {
    %c0_i32 = arith.constant 0 : i32
    %c0_i32_0 = arith.constant 0 : i32
    %c0_i32_1 = arith.constant 0 : i32
    return %c0_i32, %c0_i32_0 : i32, i32
  }
  func.func @transform_4(%arg0: i32, %arg1: i32) -> (i32, i32) {
    %c0_i32 = arith.constant 0 : i32
    %c0_i32_0 = arith.constant 0 : i32
    %c0_i32_1 = arith.constant 0 : i32
    return %c0_i32, %c0_i32_0 : i32, i32
  }
  func.func @transform_5(%arg0: i32, %arg1: i32) -> (i32, i32) {
    %c0_i32 = arith.constant 0 : i32
    %c0_i32_0 = arith.constant 0 : i32
    %c0_i32_1 = arith.constant 0 : i32
    return %c0_i32, %c0_i32_0 : i32, i32
  }
  func.func @transform_6(%arg0: i32, %arg1: i32) -> (i32, i32, i32) {
    %c0_i32 = arith.constant 0 : i32
    %c0_i32_0 = arith.constant 0 : i32
    %c0_i32_1 = arith.constant 0 : i32
    %c0_i32_2 = arith.constant 0 : i32
    return %c0_i32, %c0_i32_0, %c0_i32_1 : i32, i32, i32
  }
  func.func @transform_7(%arg0: i32, %arg1: i32) -> (i32, i32) {
    %c0_i32 = arith.constant 0 : i32
    %c0_i32_0 = arith.constant 0 : i32
    %c0_i32_1 = arith.constant 0 : i32
    return %c0_i32, %c0_i32_0 : i32, i32
  }
  func.func @transform_8(%arg0: i32, %arg1: i32) -> (i32, i32) {
    %c0_i32 = arith.constant 0 : i32
    %c0_i32_0 = arith.constant 0 : i32
    %c0_i32_1 = arith.constant 0 : i32
    return %c0_i32, %c0_i32_0 : i32, i32
  }
  func.func @transform_9(%arg0: i32, %arg1: i32) -> (i32, i32) {
    %c0_i32 = arith.constant 0 : i32
    %c0_i32_0 = arith.constant 0 : i32
    %c0_i32_1 = arith.constant 0 : i32
    return %c0_i32, %c0_i32_0 : i32, i32
  }
  func.func @transform_10(%arg0: i32, %arg1: i32) -> (i32, i32) {
    %c0_i32 = arith.constant 0 : i32
    %c0_i32_0 = arith.constant 0 : i32
    %c0_i32_1 = arith.constant 0 : i32
    return %c0_i32, %c0_i32_0 : i32, i32
  }
  func.func @transform_11(%arg0: i32, %arg1: i32) -> (i32, i32) {
    %c0_i32 = arith.constant 0 : i32
    %c0_i32_0 = arith.constant 0 : i32
    %c0_i32_1 = arith.constant 0 : i32
    return %c0_i32, %c0_i32_0 : i32, i32
  }
  func.func @transform_12(%arg0: i32, %arg1: i32) -> (i32, i32) {
    %c0_i32 = arith.constant 0 : i32
    %c0_i32_0 = arith.constant 0 : i32
    %c0_i32_1 = arith.constant 0 : i32
    return %c0_i32, %c0_i32_0 : i32, i32
  }
  func.func @transform_13(%arg0: i32, %arg1: i32) -> (i32, i32) {
    %c0_i32 = arith.constant 0 : i32
    %c0_i32_0 = arith.constant 0 : i32
    %c0_i32_1 = arith.constant 0 : i32
    return %c0_i32, %c0_i32_0 : i32, i32
  }
  func.func @transform_14(%arg0: i32, %arg1: i32) -> (i32, i32) {
    %c0_i32 = arith.constant 0 : i32
    %c0_i32_0 = arith.constant 0 : i32
    %c0_i32_1 = arith.constant 0 : i32
    return %c0_i32, %c0_i32_0 : i32, i32
  }
  func.func @transform_15(%arg0: i32, %arg1: i32) -> (i32, i32) {
    %c0_i32 = arith.constant 0 : i32
    %c0_i32_0 = arith.constant 0 : i32
    %c0_i32_1 = arith.constant 0 : i32
    return %c0_i32, %c0_i32_0 : i32, i32
  }
  func.func @transform_16(%arg0: i32, %arg1: i32) -> (i32, i32) {
    %c0_i32 = arith.constant 0 : i32
    %c0_i32_0 = arith.constant 0 : i32
    %c0_i32_1 = arith.constant 0 : i32
    return %c0_i32, %c0_i32_0 : i32, i32
  }
  func.func @transform_17(%arg0: i32, %arg1: i32) -> (i32, i32) {
    %c0_i32 = arith.constant 0 : i32
    %c0_i32_0 = arith.constant 0 : i32
    %c0_i32_1 = arith.constant 0 : i32
    return %c0_i32, %c0_i32_0 : i32, i32
  }
  func.func @transform_18(%arg0: i32, %arg1: i32) -> (i32, i32, i32) {
    %c0_i32 = arith.constant 0 : i32
    %c0_i32_0 = arith.constant 0 : i32
    return %arg0, %arg1, %c0_i32 : i32, i32, i32
  }
}

</mosaic_0001>

<bundles_post_ra>
// kernel: tpu_custom_call.1
= control target key start
LH: loop header
LB: loop body
LE: loop exit
PB: predicated region body
PF: predicated region fallthrough
CT: control target
= control target key end

     0   :  { %s4069_s0 = inlined_call_operand.hbm [shape: f32[2,32,128], index: 0, kind: input, shape index: {}]   ;;  %s4070_s1 = inlined_call_operand.hbm [shape: f32[2,32,128], index: 1, kind: input, shape index: {}]   ;;  %s4071_s2 = inlined_call_operand.hbm [shape: bf16[128,256], index: 2, kind: input, shape index: {}]   ;;  %s4072_s3 = inlined_call_operand.vmem [shape: f32[1,256], index: 3, kind: input, shape index: {}]   ;;  %s4073_s4 = inlined_call_operand.hbm [shape: bf16[128,128], index: 4, kind: input, shape index: {}]   ;;  %s4074_s5 = inlined_call_operand.hbm [shape: f32[1,128], index: 5, kind: input, shape index: {}]   ;;  %s4075_s6 = inlined_call_operand.hbm [shape: bf16[4,32,128], index: 6, kind: input, shape index: {}]   ;;  %s4076_s7 = inlined_call_operand.vmem [shape: f32[1,128], index: 7, kind: input, shape index: {}]   ;;  %s4077_s8 = inlined_call_operand.hbm [shape: bf16[128,256], index: 8, kind: input, shape index: {}]   ;;  %s4078_s9 = inlined_call_operand.vmem [shape: f32[1,256], index: 9, kind: input, shape index: {}]   ;;  %s4079_s10 = inlined_call_operand.hbm [shape: bf16[256,128], index: 10, kind: input, shape index: {}]   ;;  %s4080_s11 = inlined_call_operand.vmem [shape: f32[1,128], index: 11, kind: input, shape index: {}]   ;;  %s4081_s12 = inlined_call_operand.vmem [shape: f32[1,128], index: 12, kind: input, shape index: {}]   ;;  %s4082_s13 = inlined_call_operand.vmem [shape: f32[1,128], index: 13, kind: input, shape index: {}]   ;;  %s4083_s14 = inlined_call_operand.vmem [shape: f32[1,128], index: 14, kind: input, shape index: {}]   ;;  %s4084_s15 = inlined_call_operand.vmem [shape: f32[1,128], index: 15, kind: input, shape index: {}]   ;;  %s4085_s16 = inlined_call_operand.vmem [shape: f32[1,128], index: 16, kind: input, shape index: {}]   ;;  %s4086_s17 = inlined_call_operand.vmem [shape: f32[1,128], index: 17, kind: input, shape index: {}]   ;;  %s4087_s18 = inlined_call_operand.hbm [shape: f32[2,32,128], index: 18, kind: output, shape index: {}]  }
   0x1   :  { %4100 = sst [smem:[#allocation36_spill]] %s4069_s0 }
   0x2   :  { %4101 = sst [smem:[#allocation37_spill]] %s4070_s1 }
   0x3   :  { %4102 = sst [smem:[#allocation38_spill]] %s4071_s2 }
   0x4   :  { %4103 = sst [smem:[#allocation39_spill]] %s4072_s3 }
   0x5   :  { %4104 = sst [smem:[#allocation40_spill]] %s4073_s4 }
   0x6   :  { %4105 = sst [smem:[#allocation41_spill]] %s4074_s5 }
   0x7   :  { %4106 = sst [smem:[#allocation42_spill]] %s4075_s6 }
   0x8   :  { %4107 = sst [smem:[#allocation43_spill]] %s4076_s7 }
   0x9   :  { %4108 = sst [smem:[#allocation44_spill]] %s4077_s8 }
   0xa   :  { %4109 = sst [smem:[#allocation45_spill]] %s4078_s9 }
   0xb   :  { %4110 = sst [smem:[#allocation46_spill]] %s4079_s10 }
   0xc   :  { %4111 = sst [smem:[#allocation47_spill]] %s4080_s11 }
   0xd   :  { %4112 = sst [smem:[#allocation48_spill]] %s4081_s12 }
   0xe   :  { %4113 = sst [smem:[#allocation49_spill]] %s4082_s13 }
   0xf   :  { %4114 = sst [smem:[#allocation50_spill]] %s4083_s14 }
  0x10   :  { %4115 = sst [smem:[#allocation51_spill]] %s4084_s15 }
  0x11   :  { %4116 = sst [smem:[#allocation52_spill]] %s4087_s18 }
  0x12   :  { %23 = vsyncpa [#allocation6], 0 }
  0x13   :  { %25 = vsyncpa [#allocation6 + $0x1], 0 }
  0x14   :  { %26 = vsyncpa [#allocation9], 0 }
  0x15   :  { %28 = vsyncpa [#allocation9 + $0x1], 0 }
  0x16   :  { %29 = vsyncpa [#allocation12], 0 }
  0x17   :  { %30 = vsyncpa [#allocation15], 0 }
  0x18   :  { %31 = vsyncpa [#allocation18], 0 }
  0x19   :  { %32 = vsyncpa [#allocation7], 0 }
  0x1a   :  { %34 = vsyncpa [#allocation7 + $0x1], 0  ;;  %s3599_s27 = smov 0   ;;  %s3601_s28 = smov 0  }
  0x1b   :  { %s3603_s16 = smov 0   ;;  %s3605_s29 = smov 0  }
  0x1c   :  { %s3607_s17 = smov 0   ;;  %s3609_s30 = smov 0  }
  0x1d   :  { %s3611_s0 = smov 0   ;;  %s3613_s19 = smov 0  }
  0x1e   :  { %s3615_s1 = smov 0   ;;  %s3617_s20 = smov 0  }
  0x1f   :  { %s3619_s21 = smov 0  }
  0x20 LB: > { %4117 = sst [smem:[#allocation27_spill]] %s3466_s30  ;;  %s3655_s22 = sadd.s32 4294967295, %s3486_s21   ;;  %s3486_s21 = sphi %s3619_s21, %s40_s21   ;;  %s3482_s20 = sphi %s3617_s20, %s4160_s20   ;;  %s3478_s1 = sphi %s3615_s1, %s4159_s1   ;;  %s3474_s19 = sphi %s3613_s19, %s4158_s19   ;;  %s3470_s0 = sphi %s3611_s0, %s4166_s0   ;;  %s3466_s30 = sphi %s3609_s30, %s4156_s30   ;;  %s3462_s17 = sphi %s3607_s17, %s4165_s17   ;;  %s3458_s29 = sphi %s3605_s29, %s4164_s29   ;;  %s3454_s16 = sphi %s3603_s16, %s4163_s16   ;;  %s3450_s28 = sphi %s3601_s28, %s4162_s28   ;;  %s3446_s27 = sphi %s3599_s27, %s4161_s27  }
  0x21   : > { %4118 = sst [smem:[#allocation28_spill]] %s3470_s0  ;;  %p2402_p0 = scmp.ge.s32.totalorder %s3486_s21, 1 }
  0x22   : > { %4119 = sst [smem:[#allocation29_spill]] %s3474_s19  ;;  %p73_p1 = scmp.eq.s32.totalorder %s3655_s22, 0 }
  0x23   : > { %4120 = sst [smem:[#allocation30_spill]] %s3478_s1  ;;  %p460_p2 = scmp.eq.s32.totalorder %s3655_s22, 3 }
  0x24   : > { %4121 = sst [smem:[#allocation31_spill]] %s3482_s20  ;;  %p473_p3 = scmp.lt.s32.totalorder %s3486_s21, 5 }
  0x25   : > { %s4122_s24 = sld [smem:[#allocation38_spill]]  ;;  %s3488_s18 = smov [#allocation10]  }
  0x26   : > { %p3664_p4 = pnand %p2402_p0, %p473_p3  ;;  %s486_s15 = sshll.u32 %s3488_s18, 4  ;;  %s487_s15 = int_to_ptr.vmem [resolvable:$true] %s486_s15 }
  0x27   : > { %s4126_s4 = sld [smem:[#allocation40_spill]]  ;;  %s3489_s23 = smov [#allocation11]  }
  0x28   : > { %s4123_s26 = scalar_select %p3664_p4, 1, 0 }
  0x29   : > { %p2907_p5 = pneg %p3664_p4  ;;  %s4091_s9 = smov 128  }
  0x2a   : > { %4124 = sst [smem:[#allocation32_spill]] %s4123_s26  ;;  %s4093_s18 = smov 8  }
  0x2b   : > { %s484_s25 = sshll.u32 %s4122_s24, 4  ;;  %p3672_p6 = pnand %p2907_p5, %p73_p1  ;;  %s485_s25 = int_to_ptr.hbm [resolvable:$true] %s484_s25 }
  0x2c   : > { %s503_s24 = sshll.u32 %s3489_s23, 4  ;;  %s4127_s6 = sld [smem:[#allocation42_spill]]  ;;  %s504_s24 = int_to_ptr.vmem [resolvable:$true] %s503_s24 }
  0x2d   : > { %s501_s2 = sshll.u32 %s4126_s4, 4  ;;  %s3492_s11 = smov 64   ;;  %s502_s2 = int_to_ptr.hbm [resolvable:$true] %s501_s2 }
  0x2e   : > { %2910 = dma.hbm_to_vmem [thread:$0]  (!%p3672_p6), %s485_s25, 2048, %s487_s15, [#allocation9], %s4091_s9, %s4091_s9, %s4093_s18  }
  0x2f   : > { %s3493_s19 = smov 4   ;;  %s3494_s4 = smov [#allocation14]  }
  0x30   : > { %2913 = dma.hbm_to_vmem [thread:$0]  (!%p3672_p6), %s502_s2, 1024, %s504_s24, [#allocation12], %s3492_s11, %s3492_s11, %s3493_s19  }
  0x31   : > { %s529_s23 = sshll.u32 %s3494_s4, 4  ;;  %s4128_s5 = sld [smem:[#allocation41_spill]]  ;;  %s530_s23 = int_to_ptr.vmem [resolvable:$true] %s529_s23 }
  0x32   : > { %s527_s7 = sshll.u32 %s4127_s6, 4  ;;  %s4129_s8 = sld [smem:[#allocation44_spill]]  ;;  %s528_s7 = int_to_ptr.hbm [resolvable:$true] %s527_s7 }
  0x33   : > { %2919 = dma.hbm_to_vmem [thread:$0]  (!%p3672_p6), %s528_s7, 1024, %s530_s23, [#allocation15], %s3492_s11, %s3492_s11, %s3493_s19  }
  0x34   : > { %s3495_s25 = smov [#allocation13]   ;;  %s3496_s3 = smov [#allocation16]  }
  0x35   : > { %s518_s2 = sshll.u32 %s3495_s25, 4  ;;  %s546_s4 = sshll.u32 %s3496_s3, 4  ;;  %s519_s2 = int_to_ptr.vmem [resolvable:$true] %s518_s2  ;;  %s547_s4 = int_to_ptr.vmem [resolvable:$true] %s546_s4 }
  0x36   : > { %s4130_s10 = sld [smem:[#allocation46_spill]]  ;;  %s2401_s15 = sadd.s32 4294967294, %s3486_s21  }
  0x37   : > { %s516_s26 = sshll.u32 %s4128_s5, 4  ;;  %s49_s12 = sadd.s32 1, %s3478_s1  ;;  %s517_s26 = int_to_ptr.hbm [resolvable:$true] %s516_s26 }
  0x38   : > { %s544_s13 = sshll.u32 %s4129_s8, 4  ;;  %s52_s25 = sadd.s32 1, %s3482_s20  ;;  %s545_s13 = int_to_ptr.hbm [resolvable:$true] %s544_s13 }
  0x39   : > { %2916 = dma.hbm_to_vmem [thread:$0]  (!%p3672_p6), %s517_s26, 16, %s519_s2, [#allocation12]  }
  0x3a   : > { %2922 = dma.hbm_to_vmem [thread:$0]  (!%p3672_p6), %s545_s13, 2048, %s547_s4, [#allocation15], %s4091_s9, %s4091_s9, %s4093_s18  }
  0x3b   : > { %s3497_s26 = smov [#allocation17]   ;;  %p50_p7 = scmp.ge.s32.totalorder %s49_s12, 2 }
  0x3c   : > { %s561_s24 = sshll.u32 %s4130_s10, 4  ;;  %s563_s23 = sshll.u32 %s3497_s26, 4  ;;  %s562_s24 = int_to_ptr.hbm [resolvable:$true] %s561_s24  ;;  %s564_s23 = int_to_ptr.vmem [resolvable:$true] %s563_s23 }
  0x3d   : > { %2925 = dma.hbm_to_vmem [thread:$0]  (!%p3672_p6), %s562_s24, 2048, %s564_s23, [#allocation18], %s3492_s11, %s3492_s11, %s3493_s19  }
  0x3e   : > { %s59_s2 = sadd.s32 1, %s3466_s30  ;;  %p66_p8 = scmp.ne.s32.totalorder %s3466_s30, %s3462_s17 }
  0x3f   : > { %p67_p9 = scmp.eq.s32.totalorder %s3486_s21, 0  ;;  %s4168_s12 = smov (%p50_p7, %s49_s12), 0 }
  0x40   : > { %4131 = sst [smem:[#allocation33_spill]] %s4168_s12  ;;  %s4170_s25 = smov (!%p50_p7, %s52_s25), %s3482_s20 }
  0x41   : > { %p3719_p10 = por %p67_p9, %p66_p8  ;;  %p72_p11 = scmp.ne.s32.totalorder %s3462_s17, %s3458_s29 }
  0x42   : > { %p54_p12 = scmp.ge.s32.totalorder %s4170_s25, 2  ;;  %s445_s11 = ssub.s32 %s3478_s1, %s4168_s12 }
  0x43   : > { %p3729_p13 = por %p73_p1, %p72_p11  ;;  %s449_s13 = sadd.s32 1, %s3454_s16 }
  0x44   : > { %s4172_s25 = smov (%p54_p12, %s4170_s25), 0  ;;  %p459_p0 = scmp.ne.s32.totalorder %s3454_s16, %s3450_s28 }
  0x45   : > { %4134 = sst [smem:[#allocation34_spill]] %s4172_s25  ;;  %p465_p3 = scmp.ne.s32.totalorder %s3450_s28, %s3446_s27 }
  0x46   : > { %s56_s3 = ssub.s32 %s3482_s20, %s4172_s25  ;;  %p466_p5 = scmp.eq.s32.totalorder %s2401_s15, 3 }
  0x47   : > { %p57_p6 = scmp.eq.s32.totalorder %s56_s3, 0  ;;  %s446_s29 = sor.u32 %s445_s11, %s56_s3 }
  0x48   : > { %p447_p7 = scmp.eq.s32.totalorder %s446_s29, 0  ;;  %p3744_p8 = por %p460_p2, %p459_p0 }
  0x49   : > { %s3749_s7 = scalar_select %p57_p6, %s3466_s30, %s59_s2  }
  0x4a   : > { %s3752_s0 = scalar_select %p447_p7, %s3454_s16, %s449_s13  }
  0x4b   : > { %4136 = sst [smem:[#allocation35_spill]] %s3749_s7  ;;  %p3754_p9 = por %p466_p5, %p465_p3 }
  0x4c   : > { %p2943_p11 = scmp.lt.s32.totalorder %s3486_s21, 4  ;;  %s598_s26 = sand.u32 1, %s3466_s30  }
  0x4d   : > { %s2783_s23 = sshll.u32 %s3482_s20, 5  ;;  %s2410_s15 = sshll.u32 %s598_s26, 5 }
  0x4e   : > { %s4138_s29 = sld [smem:[#allocation36_spill]]  ;;  %s602_s5 = scalar_lea.vmem [#allocation5], %s2410_s15 }
  0x4f   : > { %s610_s6 = sshll.u32 %s602_s5, 4  ;;  %p2927_p2 = pnand %p2943_p11, %p3719_p10  ;;  %s611_s6 = int_to_ptr.vmem [resolvable:$true] %s610_s6 }
  0x50   : > { %s4139_s8 = sld [smem:[#allocation37_spill]]  ;;  %s624_s25 = scalar_lea.vmem [#allocation8], %s2410_s15 }
  0x51   : > { %s632_s12 = sshll.u32 %s624_s25, 4  ;;  %s599_s1 = scalar_lea.sflag [#allocation6], %s598_s26  ;;  %s633_s12 = int_to_ptr.vmem [resolvable:$true] %s632_s12 }
  0x52   : > { %s4140_s7 = smov 8   ;;  %s4141_s30 = smov 128  }
  0x54   : > { %s607_s9 = scalar_lea.hbm %s4138_s29, %s2783_s23 }
  0x55   : > { %s608_s18 = sshll.u32 %s607_s9, 4  ;;  %s620_s9 = sand.u32 1, %s3486_s21   ;;  %s609_s18 = int_to_ptr.hbm [resolvable:$true] %s608_s18 }
  0x56   : > { %s629_s10 = scalar_lea.hbm %s4139_s8, %s2783_s23  ;;  %s621_s5 = scalar_lea.sflag [#allocation9], %s620_s9 }
  0x57   : > { %s630_s20 = sshll.u32 %s629_s10, 4  ;;  %644 = sbr.rel (%p3664_p4) target bundleno = 2031 (0x7ef), region = 92  ;;  %s631_s20 = int_to_ptr.hbm [resolvable:$true] %s630_s20 }
  0x58   : > { %2929 = dma.hbm_to_vmem [thread:$0]  (!%p2927_p2), %s609_s18, 512, %s611_s6, %s599_s1, %s4141_s30, %s4141_s30, %s4140_s7  }
  0x59   : > { %2932 = dma.hbm_to_vmem [thread:$0]  (!%p2927_p2), %s631_s20, 512, %s633_s12, %s621_s5, %s4141_s30, %s4141_s30, %s4140_s7  }
  0x5a   : > { %s646_s8 = sand.u32 (!%p3664_p4), 1, %s3462_s17  }
  0x5b   : > { %s2417_s10 = sshll.u32 (!%p3664_p4), %s646_s8, 5  ;;  %s647_s25 = scalar_lea.sflag (!%p3664_p4), [#allocation6], %s646_s8 }
  0x5c   : > { %s3779_s26 = scalar_lea.vmem [#allocation5], %s2417_s10 }
  0x5d   : > { %3417 = dma.done.wait (%p3729_p13), %s647_s25, 512  }
  0x5e   : > { %3419 = vsyncadd (%p3729_p13), %s647_s25, 4294966784  ;;  %s656_s6 = sand.u32 1, %s3655_s22   ;;  %s3786_s30 = scalar_lea.vmem [#allocation8], %s2417_s10 }
  0x5f   : > { %s657_s1 = scalar_lea.sflag [#allocation9], %s656_s6 }
  0x60   : > { %3421 = dma.done.wait (%p3729_p13), %s657_s1, 512  }
  0x61   : > { %3423 = vsyncadd (%p3729_p13), %s657_s1, 4294966784 }
  0x62   : > { %3425 = dma.done.wait (%p73_p1), [#allocation9], 2048  }
  0x63   : > { %3427 = vsyncadd (%p73_p1), [#allocation9], 4294965248 }
  0x64   : > { %3429 = dma.done.wait (%p73_p1), [#allocation12], 1040  }
  0x65   : > { %3431 = vsyncadd (%p73_p1), [#allocation12], 4294966256 }
  0x66   : > { %3433 = dma.done.wait (%p73_p1), [#allocation15], 3072  }
  0x67   : > { %3435 = vsyncadd (%p73_p1), [#allocation15], 4294964224 }
  0x68   : > { %3437 = dma.done.wait (%p73_p1), [#allocation18], 2048  }
  0x69   : > { %3439 = vsyncadd (%p73_p1), [#allocation18], 4294965248  ;;  %s746_s20 = sand.u32 1, %s3450_s28   ;;  %s4143_s19 = sld [smem:[#allocation28_spill]] }
  0x6a   : > { %s2425_s18 = sshll.u32 %s746_s20, 4 }
  0x6b   : > { %s3811_s12 = scalar_lea.vmem [#allocation19], %s2425_s18 }
  0x6f   : > { %p2426_p4 = scmp.ne.s32.totalorder %s4143_s19, 0 }
  0x70   : > { %s4144_s23 = sld [smem:[#allocation39_spill]] (!%p2426_p4)  ;;  %s3498_s15 = smov (!%p2426_p4), 64  }
  0x71   : > { %754 = sbr.rel (%p2426_p4) target bundleno = 488 (0x1e8), region = 128  ;;  %s3499_s11 = smov (!%p2426_p4), 96  }
  0x72   : > { %s3500_s3 = smov (!%p2426_p4), 32  }
  0x76   : > { %v2485_v0 = vld [vmem:[#allocation10 + $0x70] sm:$0xf]  ;;  %v2800_v1 = vld [vmem:[#allocation10 + $0x74] sm:$0xf0]  ;;  %v2799_v2 = vld [vmem:[#allocation10 + $0x74] sm:$0xf] }
  0x77   : > { %v2486_v3 = vor.u32 %v2800_v1, %v2485_v0  ;;  %v2487_v4 = vld [vmem:[#allocation10 + $0x78] sm:$0xf0]  ;;  %v2477_v6 = vld [vmem:[#allocation10 + $0x60] sm:$0xf]  ;;  %v2798_v8 = vld [vmem:[#allocation10 + $0x64] sm:$0xf0] }
  0x78   : > { %v2808_v5 = vld [vmem:[#allocation11 + $0x38] sm:$0xff]  ;;  %v2490_v7 = vor.u32 %v2799_v2, %v2487_v4  ;;  %v2797_v9 = vld [vmem:[#allocation10 + $0x64] sm:$0xf]  ;;  %v2479_v10 = vld [vmem:[#allocation10 + $0x68] sm:$0xf0]  ;;  %v2478_v11 = vor.u32 %v2798_v8, %v2477_v6  ;;  %vm1006_vm0 = vcmask 257024  }
  0x79   : > { %871 = vmatpush.bf16.msra.mxu0 %v2486_v3  ;;  %2869 = vmatpush.bf16.msra.mxu3 %v2486_v3  ;;  %v2482_v12 = vor.u32 %v2797_v9, %v2479_v10  ;;  %v2807_v13 = vld [vmem:[#allocation11 + $0x30] sm:$0xff]  ;;  %v2796_v15 = vld [vmem:[#allocation10 + $0x54] sm:$0xf0]  ;;  %v2471_v17 = vld [vmem:[#allocation10 + $0x58] sm:$0xf0] }
  0x7a   : > { %890 = vmatpush.bf16.msra.mxu1 %v2490_v7  ;;  %979 = vmatpush.bf16.msra.mxu2 %v2808_v5  ;;  %v2469_v14 = vld [vmem:[#allocation10 + $0x50] sm:$0xf]  ;;  %v2795_v16 = vld [vmem:[#allocation10 + $0x54] sm:$0xf]  ;;  %v2806_v20 = vld [vmem:[#allocation11 + $0x28] sm:$0xff] }
  0x7b   : > { %v2470_v18 = vor.u32 %v2796_v15, %v2469_v14  ;;  %v2474_v19 = vor.u32 %v2795_v16, %v2471_v17  ;;  %v2461_v21 = vld [vmem:[#allocation10 + $0x40] sm:$0xf]  ;;  %v2794_v22 = vld [vmem:[#allocation10 + $0x44] sm:$0xf0]  ;;  %v2793_v23 = vld [vmem:[#allocation10 + $0x44] sm:$0xf] }
  0x7c   : > { %v2463_v24 = vld [vmem:[#allocation10 + $0x48] sm:$0xf0]  ;;  %v2462_v25 = vor.u32 %v2794_v22, %v2461_v21  ;;  %v2805_v27 = vld [vmem:[#allocation11 + $0x20] sm:$0xff]  ;;  %v2453_v28 = vld [vmem:[#allocation10 + $0x30] sm:$0xf] }
  0x7d   : > { %872 = vmatpush.bf16.msra.mxu0 %v2478_v11  ;;  %2870 = vmatpush.bf16.msra.mxu3 %v2478_v11  ;;  %v2466_v26 = vor.u32 %v2793_v23, %v2463_v24  ;;  %v2792_v29 = vld [vmem:[#allocation10 + $0x34] sm:$0xf0]  ;;  %v2791_v30 = vld [vmem:[#allocation10 + $0x34] sm:$0xf]  ;;  %v2455_v31 = vld [vmem:[#allocation10 + $0x38] sm:$0xf0] }
  0x7e   : > { %891 = vmatpush.bf16.msra.mxu1 %v2482_v12  ;;  %980 = vmatpush.bf16.msra.mxu2 %v2807_v13  ;;  %v2454_v32 = vor.u32 %v2792_v29, %v2453_v28  ;;  %v2804_v33 = vld [vmem:[#allocation11 + $0x18] sm:$0xff]  ;;  %v2458_v34 = vor.u32 %v2791_v30, %v2455_v31  ;;  %v2445_v35 = vld [vmem:[#allocation10 + $0x20] sm:$0xf]  ;;  %v2790_v36 = vld [vmem:[#allocation10 + $0x24] sm:$0xf0] }
  0x7f   : > { %v2789_v37 = vld [vmem:[#allocation10 + $0x24] sm:$0xf]  ;;  %v2447_v38 = vld [vmem:[#allocation10 + $0x28] sm:$0xf0]  ;;  %v2446_v39 = vor.u32 %v2790_v36, %v2445_v35  ;;  %v2803_v40 = vld [vmem:[#allocation11 + $0x10] sm:$0xff] }
  0x80   : > { %v2450_v41 = vor.u32 %v2789_v37, %v2447_v38  ;;  %v2437_v42 = vld [vmem:[#allocation10 + $0x10] sm:$0xf]  ;;  %v2788_v43 = vld [vmem:[#allocation10 + $0x14] sm:$0xf0]  ;;  %v2787_v44 = vld [vmem:[#allocation10 + $0x14] sm:$0xf] }
  0x81   : > { %873 = vmatpush.bf16.msra.mxu0 %v2470_v18  ;;  %2871 = vmatpush.bf16.msra.mxu3 %v2470_v18  ;;  %v2439_v45 = vld [vmem:[#allocation10 + $0x18] sm:$0xf0]  ;;  %v755_v46 = vld [vmem:[%s3779_s26] sm:$0xff]  ;;  %v756_v47 = vld [vmem:[%s3779_s26 + $0x8] sm:$0xff]  ;;  %v2438_v51 = vor.u32 %v2788_v43, %v2437_v42 }
  0x82   : > { %892 = vmatpush.bf16.msra.mxu1 %v2474_v19  ;;  %981 = vmatpush.bf16.msra.mxu2 %v2806_v20  ;;  %v759_v48 = vld [vmem:[%s3786_s30] sm:$0xff]  ;;  %v760_v49 = vld [vmem:[%s3786_s30 + $0x8] sm:$0xff]  ;;  %v757_v50 = vld [vmem:[%s3779_s26 + $0x10] sm:$0xff]  ;;  %v2442_v55 = vor.u32 %v2787_v44, %v2439_v45  ;;  %v909_v6 = vpack.c.bf16 %v756_v47, %v755_v46 }
  0x83   : > { %v758_v52 = vld [vmem:[%s3779_s26 + $0x18] sm:$0xff]  ;;  %v761_v53 = vld [vmem:[%s3786_s30 + $0x10] sm:$0xff]  ;;  %v2802_v56 = vld [vmem:[#allocation11 + $0x8] sm:$0xff]  ;;  %v763_v61 = vadd.f32 %v759_v48, %v755_v46  ;;  %v764_v62 = vadd.f32 %v760_v49, %v756_v47 }
  0x84   : > { %v762_v54 = vld [vmem:[%s3786_s30 + $0x18] sm:$0xff]  ;;  %v2429_v57 = vld [vmem:[#allocation10] sm:$0xf]  ;;  %v2786_v58 = vld [vmem:[#allocation10 + $0x4] sm:$0xf0]  ;;  %v765_v63 = vadd.f32 %v761_v53, %v757_v50  ;;  %v910_v7 = vpack.c.bf16 %v758_v52, %v757_v50 }
  0x85   : > { %874 = vmatpush.bf16.msra.mxu0 %v2462_v25  ;;  %2872 = vmatpush.bf16.msra.mxu3 %v2462_v25  ;;  %v2785_v59 = vld [vmem:[#allocation10 + $0x4] sm:$0xf]  ;;  %v2431_v60 = vld [vmem:[#allocation10 + $0x8] sm:$0xf0]  ;;  %v766_v0 = vadd.f32 %v762_v54, %v758_v52  ;;  %v2430_v1 = vor.u32 %v2786_v58, %v2429_v57  ;;  %v767_v4 = vpack.c.bf16 %v764_v62, %v763_v61  ;;  %v785_v8 = vld [vmem:[%s4144_s23] sm:$0x3] }
  0x86   : > { %893 = vmatpush.bf16.msra.mxu1 %v2466_v26  ;;  %982 = vmatpush.bf16.msra.mxu2 %v2805_v27  ;;  %v2434_v2 = vor.u32 %v2785_v59, %v2431_v60  ;;  %v2801_v3 = vld [vmem:[#allocation11] sm:$0xff]  ;;  %v787_v9 = vperm.slane %v785_v8, 0  ;;  %v788_v10 = vperm.slane %v785_v8, 1 }
  0x87   : > { %v768_v5 = vpack.c.bf16 %v766_v0, %v765_v63  ;;  %v3055_v17 = vld [vmem:[#allocation13] ss:$0 sm:$0xff] }
  0x89   : > { %875 = vmatpush.bf16.msra.mxu0 %v2454_v32  ;;  %2873 = vmatpush.bf16.msra.mxu3 %v2454_v32 }
  0x8a   : > { %894 = vmatpush.bf16.msra.mxu1 %v2458_v34  ;;  %983 = vmatpush.bf16.msra.mxu2 %v2804_v33 }
  0x8d   : > { %876 = vmatpush.bf16.msra.mxu0 %v2446_v39  ;;  %2874 = vmatpush.bf16.msra.mxu3 %v2446_v39 }
  0x8e   : > { %895 = vmatpush.bf16.msra.mxu1 %v2450_v41  ;;  %984 = vmatpush.bf16.msra.mxu2 %v2803_v40 }
  0x91   : > { %877 = vmatpush.bf16.msra.mxu0 %v2438_v51  ;;  %2875 = vmatpush.bf16.msra.mxu3 %v2438_v51 }
  0x92   : > { %896 = vmatpush.bf16.msra.mxu1 %v2442_v55  ;;  %985 = vmatpush.bf16.msra.mxu2 %v2802_v56 }
  0x95   : > { %878 = vmatpush.bf16.msra.mxu0 %v2430_v1  ;;  %2876 = vmatpush.bf16.msra.mxu3 %v2430_v1 }
  0x96   : > { %897 = vmatpush.bf16.msra.mxu1 %v2434_v2  ;;  %986 = vmatpush.bf16.msra.mxu2 %v2801_v3 }
  0x98   : > { %879 = vmatmul.bf16.vlgmr.msra.gmra.mxu0 %v767_v4  ;;  %884 = vmatmul.bf16.vlgmr.msra.gmra.mxu3 %v768_v5 }
  0x99   : > { %898 = vmatmul.bf16.vlgmr.msra.gmra.mxu1 %v767_v4  ;;  %987 = vmatmul.bf16.vlgmr.msra.gmra.mxu2 %v909_v6 }
  0xa9   : > { %992 = vmatmul.bf16.gmra.mxu2 %v910_v7  ;;  %903 = vmatmul.bf16.gmra.mxu1 %v768_v5 }
 0x115   : > { %v880_v11 = vpop.f32.mrf.mxu0 }
 0x116   : > { %v881_v12 = vadd.f32 %v880_v11, %v787_v9  ;;  %v899_v13 = vpop.f32.mrf.mxu1 }
 0x117   : > { %v900_v14 = vadd.f32 %v899_v13, %v788_v10 }
 0x118   : > { %v998_v15 = vmul.f32 0.17677669, %v881_v12 }
 0x119   : > { %v1011_v16 = vpack.c.bf16 %v900_v14, %v900_v14 }
 0x11a   : > { %v1002_v18 = vpack.c.bf16 %v998_v15, %v998_v15 }
 0x11b   : > { %1015 = vst.msk [vmem:[#allocation3] sm:$0xf] %vm1006_vm0, %v1011_v16  ;;  %1107 = vrot.lane.b32.xlu1 %v1011_v16, %s3498_s15  ;;  %1052 = vrot.lane.b32.xlu2 %v1011_v16, %s3499_s11  ;;  %v885_v19 = vpop.f32.mrf.mxu3 }
 0x11c   : > { %1007 = vst.msk [vmem:[#allocation2] sm:$0xf] %vm1006_vm0, %v1002_v18  ;;  %1031 = vrot.lane.b32.xlu0 %v1002_v18, %s3499_s11  ;;  %v886_v20 = vadd.f32 %v885_v19, %v787_v9  ;;  %v988_v21 = vpop.f32.mrf.mxu2 }
 0x11d   : > { %v882_v22 = vpop.f32.mrf.mxu0  ;;  %v989_v23 = vadd.f32 %v3055_v17, %v988_v21 }
 0x11e   : > { %v883_v24 = vadd.f32 %v882_v22, %v787_v9  ;;  %v1000_v25 = vmul.f32 0.17677669, %v886_v20  ;;  %v901_v26 = vpop.f32.mrf.mxu1 }
 0x11f   : > { %v902_v27 = vadd.f32 %v901_v26, %v788_v10  ;;  %v1019_v28 = vpack.c.bf16 %v989_v23, %v989_v23 }
 0x120   : > { %v999_v29 = vmul.f32 0.17677669, %v883_v24  ;;  %v1004_v30 = vpack.c.bf16 %v1000_v25, %v1000_v25 }
 0x121   : > { %v1012_v31 = vpack.c.bf16 %v902_v27, %v902_v27  ;;  %1023 = vst.msk [vmem:[#allocation4] sm:$0xf] %vm1006_vm0, %v1019_v28 }
 0x122   : > { %v1003_v32 = vpack.c.bf16 %v999_v29, %v999_v29  ;;  %1009 = vst.msk [vmem:[#allocation2 + $0x8] sm:$0xf] %vm1006_vm0, %v1004_v30 }
 0x123   : > { %1016 = vst.msk [vmem:[#allocation3 + $0x4] sm:$0xf] %vm1006_vm0, %v1012_v31  ;;  %1158 = vrot.lane.b32.xlu1 %v1011_v16, %s3500_s3  ;;  %1073 = vrot.lane.b32.xlu2 %v1019_v28, %s3499_s11  ;;  %v887_v33 = vpop.f32.mrf.mxu3 }
 0x124   : > { %1008 = vst.msk [vmem:[#allocation2 + $0x4] sm:$0xf] %vm1006_vm0, %v1003_v32  ;;  %1090 = vrot.lane.b32.xlu0 %v1002_v18, %s3498_s15  ;;  %v888_v34 = vadd.f32 %v887_v33, %v787_v9  ;;  %v990_v35 = vpop.f32.mrf.mxu2 }
 0x125   : > { %v991_v36 = vadd.f32 %v3055_v17, %v990_v35 }
 0x126   : > { %v1001_v37 = vmul.f32 0.17677669, %v888_v34  ;;  %v904_v38 = vpop.f32.mrf.mxu1 }
 0x127   : > { %v1020_v39 = vpack.c.bf16 %v991_v36, %v991_v36  ;;  %v905_v40 = vadd.f32 %v904_v38, %v788_v10 }
 0x128   : > { %v1005_v41 = vpack.c.bf16 %v1001_v37, %v1001_v37 }
 0x129   : > { %1024 = vst.msk [vmem:[#allocation4 + $0x4] sm:$0xf] %vm1006_vm0, %v1020_v39  ;;  %v1013_v42 = vpack.c.bf16 %v905_v40, %v905_v40 }
 0x12a   : > { %1010 = vst.msk [vmem:[#allocation2 + $0xc] sm:$0xf] %vm1006_vm0, %v1005_v41 }
 0x12b   : > { %1035 = vrot.lane.b32.xlu1 %v1004_v30, %s3499_s11  ;;  %1124 = vrot.lane.b32.xlu2 %v1019_v28, %s3498_s15  ;;  %1017 = vst.msk [vmem:[#allocation3 + $0x8] sm:$0xf] %vm1006_vm0, %v1013_v42 }
 0x12c   : > { %1141 = vrot.lane.b32.xlu0 %v1002_v18, %s3500_s3  ;;  %v993_v43 = vpop.f32.mrf.mxu2 }
 0x12d   : > { %v994_v44 = vadd.f32 %v3055_v17, %v993_v43 }
 0x12e   : > { %v906_v45 = vpop.f32.mrf.mxu1 }
 0x12f   : > { %v1021_v46 = vpack.c.bf16 %v994_v44, %v994_v44  ;;  %v907_v47 = vadd.f32 %v906_v45, %v788_v10 }
 0x131   : > { %1025 = vst.msk [vmem:[#allocation4 + $0x8] sm:$0xf] %vm1006_vm0, %v1021_v46  ;;  %v1014_v48 = vpack.c.bf16 %v907_v47, %v907_v47 }
 0x133   : > { %1175 = vrot.lane.b32.xlu2 %v1019_v28, %s3500_s3  ;;  %1092 = vrot.lane.b32.xlu1 %v1003_v32, %s3498_s15  ;;  %1018 = vst.msk [vmem:[#allocation3 + $0xc] sm:$0xf] %vm1006_vm0, %v1014_v48 }
 0x134   : > { %1033 = vrot.lane.b32.xlu0 %v1003_v32, %s3499_s11  ;;  %v995_v49 = vpop.f32.mrf.mxu2 }
 0x135   : > { %v996_v50 = vadd.f32 %v3055_v17, %v995_v49 }
 0x137   : > { %v1022_v51 = vpack.c.bf16 %v996_v50, %v996_v50 }
 0x139   : > { %1026 = vst.msk [vmem:[#allocation4 + $0xc] sm:$0xf] %vm1006_vm0, %v1022_v51 }
 0x13b   : > { %1054 = vrot.lane.b32.xlu2 %v1012_v31, %s3499_s11  ;;  %1143 = vrot.lane.b32.xlu1 %v1003_v32, %s3500_s3 }
 0x13c   : > { %1075 = vrot.lane.b32.xlu0 %v1020_v39, %s3499_s11 }
 0x143   : > { %1094 = vrot.lane.b32.xlu2 %v1004_v30, %s3498_s15  ;;  %1037 = vrot.lane.b32.xlu1 %v1005_v41, %s3499_s11 }
 0x144   : > { %1126 = vrot.lane.b32.xlu0 %v1020_v39, %s3498_s15 }
 0x14b   : > { %1109 = vrot.lane.b32.xlu2 %v1012_v31, %s3498_s15  ;;  %1077 = vrot.lane.b32.xlu1 %v1021_v46, %s3499_s11 }
 0x14c   : > { %1056 = vrot.lane.b32.xlu0 %v1013_v42, %s3499_s11 }
 0x153   : > { %1145 = vrot.lane.b32.xlu2 %v1004_v30, %s3500_s3  ;;  %1128 = vrot.lane.b32.xlu1 %v1021_v46, %s3498_s15 }
 0x154   : > { %1096 = vrot.lane.b32.xlu0 %v1005_v41, %s3498_s15 }
 0x15b   : > { %1160 = vrot.lane.b32.xlu2 %v1012_v31, %s3500_s3  ;;  %1058 = vrot.lane.b32.xlu1 %v1014_v48, %s3499_s11 }
 0x15c   : > { %1111 = vrot.lane.b32.xlu0 %v1013_v42, %s3498_s15 }
 0x163   : > { %1079 = vrot.lane.b32.xlu2 %v1022_v51, %s3499_s11  ;;  %1113 = vrot.lane.b32.xlu1 %v1014_v48, %s3498_s15 }
 0x164   : > { %1147 = vrot.lane.b32.xlu0 %v1005_v41, %s3500_s3 }
 0x16b   : > { %1130 = vrot.lane.b32.xlu2 %v1022_v51, %s3498_s15  ;;  %1164 = vrot.lane.b32.xlu1 %v1014_v48, %s3500_s3 }
 0x16c   : > { %1162 = vrot.lane.b32.xlu0 %v1013_v42, %s3500_s3 }
 0x173   : > { %1181 = vrot.lane.b32.xlu2 %v1022_v51, %s3500_s3  ;;  %1179 = vrot.lane.b32.xlu1 %v1021_v46, %s3500_s3 }
 0x174   : > { %1177 = vrot.lane.b32.xlu0 %v1020_v39, %s3500_s3 }
 0x175   : > { %v1053_v52 = vpop.permute.xlu2 %1052 }
 0x176   : > { %1065 = vst.msk [vmem:[#allocation3 + $0x10] sm:$0xf] %vm1006_vm0, %v1053_v52 }
 0x17d   : > { %v1074_v53 = vpop.permute.xlu2 %1073 }
 0x17e   : > { %1086 = vst.msk [vmem:[#allocation4 + $0x10] sm:$0xf] %vm1006_vm0, %v1074_v53 }
 0x185   : > { %v1125_v54 = vpop.permute.xlu2 %1124 }
 0x186   : > { %1137 = vst.msk [vmem:[#allocation4 + $0x20] sm:$0xf] %vm1006_vm0, %v1125_v54 }
 0x18d   : > { %v1108_v55 = vpop.permute.xlu1 %1107  ;;  %v1176_v56 = vpop.permute.xlu2 %1175 }
 0x18e   : > { %1120 = vst.msk [vmem:[#allocation3 + $0x20] sm:$0xf] %vm1006_vm0, %v1108_v55  ;;  %v1032_v57 = vpop.permute.xlu0 %1031 }
 0x18f   : > { %1188 = vst.msk [vmem:[#allocation4 + $0x30] sm:$0xf] %vm1006_vm0, %v1176_v56 }
 0x190   : > { %1044 = vst.msk [vmem:[#allocation2 + $0x10] sm:$0xf] %vm1006_vm0, %v1032_v57 }
 0x195   : > { %v1159_v58 = vpop.permute.xlu1 %1158  ;;  %v1055_v59 = vpop.permute.xlu2 %1054 }
 0x196   : > { %1171 = vst.msk [vmem:[#allocation3 + $0x30] sm:$0xf] %vm1006_vm0, %v1159_v58  ;;  %v1091_v60 = vpop.permute.xlu0 %1090 }
 0x197   : > { %1066 = vst.msk [vmem:[#allocation3 + $0x14] sm:$0xf] %vm1006_vm0, %v1055_v59 }
 0x198   : > { %1103 = vst.msk [vmem:[#allocation2 + $0x20] sm:$0xf] %vm1006_vm0, %v1091_v60 }
 0x19d   : > { %v1036_v61 = vpop.permute.xlu1 %1035  ;;  %v1095_v62 = vpop.permute.xlu2 %1094 }
 0x19e   : > { %1046 = vst.msk [vmem:[#allocation2 + $0x18] sm:$0xf] %vm1006_vm0, %v1036_v61  ;;  %v1142_v63 = vpop.permute.xlu0 %1141 }
 0x19f   : > { %1105 = vst.msk [vmem:[#allocation2 + $0x28] sm:$0xf] %vm1006_vm0, %v1095_v62 }
 0x1a0   : > { %1154 = vst.msk [vmem:[#allocation2 + $0x30] sm:$0xf] %vm1006_vm0, %v1142_v63 }
 0x1a5   : > { %v1110_v0 = vpop.permute.xlu2 %1109  ;;  %v1093_v1 = vpop.permute.xlu1 %1092 }
 0x1a6   : > { %1121 = vst.msk [vmem:[#allocation3 + $0x24] sm:$0xf] %vm1006_vm0, %v1110_v0  ;;  %v1034_v2 = vpop.permute.xlu0 %1033 }
 0x1a7   : > { %1104 = vst.msk [vmem:[#allocation2 + $0x24] sm:$0xf] %vm1006_vm0, %v1093_v1 }
 0x1a8   : > { %1045 = vst.msk [vmem:[#allocation2 + $0x14] sm:$0xf] %vm1006_vm0, %v1034_v2 }
 0x1ad   : > { %v1146_v3 = vpop.permute.xlu2 %1145  ;;  %v1144_v4 = vpop.permute.xlu1 %1143 }
 0x1ae   : > { %1156 = vst.msk [vmem:[#allocation2 + $0x38] sm:$0xf] %vm1006_vm0, %v1146_v3  ;;  %v1076_v5 = vpop.permute.xlu0 %1075 }
 0x1af   : > { %1155 = vst.msk [vmem:[#allocation2 + $0x34] sm:$0xf] %vm1006_vm0, %v1144_v4 }
 0x1b0   : > { %1087 = vst.msk [vmem:[#allocation4 + $0x14] sm:$0xf] %vm1006_vm0, %v1076_v5 }
 0x1b5   : > { %v1161_v6 = vpop.permute.xlu2 %1160  ;;  %v1038_v7 = vpop.permute.xlu1 %1037 }
 0x1b6   : > { %1172 = vst.msk [vmem:[#allocation3 + $0x34] sm:$0xf] %vm1006_vm0, %v1161_v6  ;;  %v1127_v8 = vpop.permute.xlu0 %1126 }
 0x1b7   : > { %1047 = vst.msk [vmem:[#allocation2 + $0x1c] sm:$0xf] %vm1006_vm0, %v1038_v7 }
 0x1b8   : > { %1138 = vst.msk [vmem:[#allocation4 + $0x24] sm:$0xf] %vm1006_vm0, %v1127_v8 }
 0x1bd   : > { %v1080_v9 = vpop.permute.xlu2 %1079  ;;  %v1078_v10 = vpop.permute.xlu1 %1077 }
 0x1be   : > { %1089 = vst.msk [vmem:[#allocation4 + $0x1c] sm:$0xf] %vm1006_vm0, %v1080_v9  ;;  %v1057_v11 = vpop.permute.xlu0 %1056 }
 0x1bf   : > { %1088 = vst.msk [vmem:[#allocation4 + $0x18] sm:$0xf] %vm1006_vm0, %v1078_v10 }
 0x1c0   : > { %1067 = vst.msk [vmem:[#allocation3 + $0x18] sm:$0xf] %vm1006_vm0, %v1057_v11 }
 0x1c5   : > { %v1131_v12 = vpop.permute.xlu2 %1130  ;;  %v1129_v13 = vpop.permute.xlu1 %1128 }
 0x1c6   : > { %1140 = vst.msk [vmem:[#allocation4 + $0x2c] sm:$0xf] %vm1006_vm0, %v1131_v12  ;;  %v1097_v14 = vpop.permute.xlu0 %1096 }
 0x1c7   : > { %1139 = vst.msk [vmem:[#allocation4 + $0x28] sm:$0xf] %vm1006_vm0, %v1129_v13 }
 0x1c8   : > { %1106 = vst.msk [vmem:[#allocation2 + $0x2c] sm:$0xf] %vm1006_vm0, %v1097_v14 }
 0x1cd   : > { %v1182_v15 = vpop.permute.xlu2 %1181  ;;  %v1059_v16 = vpop.permute.xlu1 %1058 }
 0x1ce   : > { %1191 = vst.msk [vmem:[#allocation4 + $0x3c] sm:$0xf] %vm1006_vm0, %v1182_v15  ;;  %v1112_v17 = vpop.permute.xlu0 %1111 }
 0x1cf   : > { %1068 = vst.msk [vmem:[#allocation3 + $0x1c] sm:$0xf] %vm1006_vm0, %v1059_v16 }
 0x1d0   : > { %1122 = vst.msk [vmem:[#allocation3 + $0x28] sm:$0xf] %vm1006_vm0, %v1112_v17 }
 0x1d5   : > { %v1114_v18 = vpop.permute.xlu1 %1113 }
 0x1d6   : > { %1123 = vst.msk [vmem:[#allocation3 + $0x2c] sm:$0xf] %vm1006_vm0, %v1114_v18  ;;  %v1148_v19 = vpop.permute.xlu0 %1147 }
 0x1d7   : > { %1157 = vst.msk [vmem:[#allocation2 + $0x3c] sm:$0xf] %vm1006_vm0, %v1148_v19 }
 0x1dd   : > { %v1165_v20 = vpop.permute.xlu1 %1164 }
 0x1de   : > { %1174 = vst.msk [vmem:[#allocation3 + $0x3c] sm:$0xf] %vm1006_vm0, %v1165_v20  ;;  %v1163_v21 = vpop.permute.xlu0 %1162 }
 0x1df   : > { %1173 = vst.msk [vmem:[#allocation3 + $0x38] sm:$0xf] %vm1006_vm0, %v1163_v21 }
 0x1e5   : > { %v1180_v22 = vpop.permute.xlu1 %1179 }
 0x1e6   : > { %1190 = vst.msk [vmem:[#allocation4 + $0x38] sm:$0xf] %vm1006_vm0, %v1180_v22  ;;  %v1178_v23 = vpop.permute.xlu0 %1177 }
 0x1e7   : > { %1189 = vst.msk [vmem:[#allocation4 + $0x34] sm:$0xf] %vm1006_vm0, %v1178_v23 }
 0x1e8 PF: > { %v2814_v24 = vld [vmem:[#allocation3 + $0x8] sm:$0xff]  ;;  %s4145_s29 = sld [smem:[#allocation28_spill]]  ;;  %vm1252_vm1 = vcmask 261120   ;;  %v2820_v26 = vld [vmem:[#allocation3 + $0x38] sm:$0xff]  ;;  %v2813_v31 = vld [vmem:[#allocation3] sm:$0xff]  ;;  %s2226_s22 = sshll.u32 %s3811_s12, 4  ;;  %s2227_s22 = int_to_ptr.vmem [resolvable:$true] %s2226_s22 }
 0x1e9   : > { %v2818_v25 = vld [vmem:[#allocation3 + $0x28] sm:$0xff]  ;;  %v1260_v27 = vsel %vm1252_vm1, %v2814_v24, 0  ;;  %v1374_v29 = vsel %vm1252_vm1, %v2820_v26, 0  ;;  %v2816_v30 = vld [vmem:[#allocation3 + $0x18] sm:$0xff]  ;;  %v2817_v32 = vld [vmem:[#allocation3 + $0x20] sm:$0xff]  ;;  %v1257_v36 = vsel %vm1252_vm1, %v2813_v31, 0 }
 0x1ea   : > { %v1336_v28 = vsel %vm1252_vm1, %v2818_v25, 0  ;;  %1268 = vmatpush.bf16.xpose.msra.mxu0 %v1260_v27  ;;  %1382 = vmatpush.bf16.xpose.msra.mxu3 %v1374_v29  ;;  %v2819_v33 = vld [vmem:[#allocation3 + $0x30] sm:$0xff]  ;;  %v1298_v34 = vsel %vm1252_vm1, %v2816_v30, 0  ;;  %v1333_v37 = vsel %vm1252_vm1, %v2817_v32, 0  ;;  %s4146_s10 = sld [smem:[#allocation43_spill]] }
 0x1eb   : > { %1344 = vmatpush.bf16.xpose.msra.mxu2 %v1336_v28  ;;  %1306 = vmatpush.bf16.xpose.msra.mxu1 %v1298_v34  ;;  %v2815_v35 = vld [vmem:[#allocation3 + $0x10] sm:$0xff]  ;;  %v1371_v38 = vsel %vm1252_vm1, %v2819_v33, 0  ;;  %s4147_s1 = sld [smem:[#allocation48_spill]] }
 0x1ec   : > { %v1295_v39 = vsel %vm1252_vm1, %v2815_v35, 0  ;;  %s4148_s19 = sld [smem:[#allocation49_spill]] }
 0x1ed   : > { %s4149_s23 = sld [smem:[#allocation45_spill]] }
 0x1ee   : > { %s2523_s2 = sshll.u32 %s4145_s29, 4  ;;  %s4150_s3 = sld [smem:[#allocation47_spill]] }
 0x1ef   : > { %s1193_s13 = sshra.s32 %s2523_s2, 3  ;;  %s1794_s25 = scalar_lea.vmem %s3779_s26, %s2523_s2 [#allocation5] }
 0x1f0   : > { %s2524_s9 = sshll.u32 %s1193_s13, 2  ;;  %s4151_s2 = sld [smem:[#allocation29_spill]] }
 0x1f1   : > { %s1196_s5 = scalar_lea.vmem [#allocation2], %s2524_s9  ;;  %s2778_s13 = sshll.u32 %s4145_s29, 1 }
 0x1f2   : > { %1269 = vmatpush.bf16.xpose.msra.mxu0 %v1257_v36  ;;  %1383 = vmatpush.bf16.xpose.msra.mxu3 %v1371_v38  ;;  %v2809_v40 = vld [vmem:[%s1196_s5] sm:$0xff]  ;;  %v2812_v42 = vld [vmem:[%s1196_s5 + $0x30] sm:$0xff]  ;;  %v2826_v36 = vld [vmem:[#allocation4 + $0x28] sm:$0xff]  ;;  %s4152_s8 = sld [smem:[#allocation50_spill]] }
 0x1f3   : > { %1345 = vmatpush.bf16.xpose.msra.mxu2 %v1333_v37  ;;  %1307 = vmatpush.bf16.xpose.msra.mxu1 %v1295_v39  ;;  %v2811_v41 = vld [vmem:[%s1196_s5 + $0x20] sm:$0xff]  ;;  %v2810_v43 = vld [vmem:[%s1196_s5 + $0x10] sm:$0xff]  ;;  %v2828_v37 = vld [vmem:[#allocation4 + $0x38] sm:$0xff]  ;;  %s4153_s6 = sld [smem:[#allocation51_spill]] }
 0x1f4   : > { %v2825_v38 = vld [vmem:[#allocation4 + $0x20] sm:$0xff]  ;;  %v2827_v39 = vld [vmem:[#allocation4 + $0x30] sm:$0xff]  ;;  %s4154_s18 = sld [smem:[#allocation52_spill]] }
 0x1f6   : > { %s2779_s9 = sshll.u32 %s4151_s2, 2 }
 0x1f9   : > { %2537 = vmatmul.msk.bf16.vlgmr.msra.gmra.mxu0 %vm1252_vm1, %v2809_v40  ;;  %2576 = vmatmul.msk.bf16.vlgmr.msra.gmra.mxu3 %vm1252_vm1, %v2812_v42  ;;  %v2822_v40 = vld [vmem:[#allocation4 + $0x8] sm:$0xff]  ;;  %v2821_v42 = vld [vmem:[#allocation4] sm:$0xff] }
 0x1fa   : > { %2563 = vmatmul.msk.bf16.vlgmr.msra.gmra.mxu2 %vm1252_vm1, %v2811_v41  ;;  %2550 = vmatmul.msk.bf16.vlgmr.msra.gmra.mxu1 %vm1252_vm1, %v2810_v43  ;;  %v2824_v41 = vld [vmem:[#allocation4 + $0x18] sm:$0xff] }
 0x1fb   : > { %1580 = vmatpush.bf16.msrb.mxu2 %v2826_v36  ;;  %1614 = vmatpush.bf16.msrb.mxu3 %v2828_v37 }
 0x1fc   : > { %1512 = vmatpush.bf16.msrb.mxu0 %v2822_v40  ;;  %1546 = vmatpush.bf16.msrb.mxu1 %v2824_v41 }
 0x1ff   : > { %1581 = vmatpush.bf16.msrb.mxu2 %v2825_v38  ;;  %1615 = vmatpush.bf16.msrb.mxu3 %v2827_v39 }
 0x200   : > { %1513 = vmatpush.bf16.msrb.mxu0 %v2821_v42 }
 0x276   : > { %v1271_v44 = vpop.f32.mrf.mxu0 }
 0x277   : > { %v1390_v45 = vsel %vm1252_vm1, %v1271_v44, -inf  ;;  %v1309_v52 = vpop.f32.mrf.mxu1 }
 0x278   : > { %1391 = vmax.xlane.f32.xlu2 %v1390_v45  ;;  %v1396_v58 = vsel %vm1252_vm1, %v1309_v52, -inf  ;;  %v2823_v45 = vld [vmem:[#allocation4 + $0x10] sm:$0xff] }
 0x279   : > { %1547 = vmatpush.bf16.msrb.mxu1 %v2823_v45 }
 0x27c   : > { %v1385_v47 = vpop.f32.mrf.mxu3 }
 0x27d   : > { %v1347_v46 = vpop.f32.mrf.mxu2  ;;  %v1408_v49 = vsel %vm1252_vm1, %v1385_v47, -inf }
 0x27e   : > { %v1402_v48 = vsel %vm1252_vm1, %v1347_v46, -inf  ;;  %v1273_v50 = vpop.f32.mrf.mxu0  ;;  %1409 = vmax.xlane.f32.xlu1 %v1408_v49 }
 0x27f   : > { %1403 = vmax.xlane.f32.xlu0 %v1402_v48  ;;  %v1393_v51 = vsel %vm1252_vm1, %v1273_v50, -inf  ;;  %v1311_v57 = vpop.f32.mrf.mxu1 }
 0x280   : > { %1394 = vmax.xlane.f32.xlu2 %v1393_v51  ;;  %v1399_v59 = vsel %vm1252_vm1, %v1311_v57, -inf }
 0x284   : > { %v1387_v54 = vpop.f32.mrf.mxu3 }
 0x285   : > { %v1349_v53 = vpop.f32.mrf.mxu2  ;;  %v1411_v56 = vsel %vm1252_vm1, %v1387_v54, -inf }
 0x286   : > { %v1405_v55 = vsel %vm1252_vm1, %v1349_v53, -inf  ;;  %1412 = vmax.xlane.f32.xlu1 %v1411_v56 }
 0x287   : > { %1406 = vmax.xlane.f32.xlu0 %v1405_v55 }
 0x28e   : > { %1400 = vmax.xlane.f32.xlu1 %v1399_v59 }
 0x28f   : > { %1397 = vmax.xlane.f32.xlu0 %v1396_v58 }
 0x2eb   : > { %v1392_v60 = vpop.xlane.xlu2 %1391 }
 0x2ec   : > { %v1414_v11 = vsub.f32 %v1271_v44, %v1392_v60 }
 0x2ee   : > { %v1422_v17 = vmul.f32 1.442695, %v1414_v11 }
 0x2f1   : > { %v1410_v62 = vpop.xlane.xlu1 %1409 }
 0x2f2   : > { %v1404_v61 = vpop.xlane.xlu0 %1403  ;;  %v1420_v0 = vsub.f32 %v1385_v47, %v1410_v62 }
 0x2f3   : > { %v1418_v63 = vsub.f32 %v1347_v46, %v1404_v61  ;;  %v1395_v1 = vpop.xlane.xlu2 %1394 }
 0x2f4   : > { %v1434_v3 = vmul.f32 1.442695, %v1420_v0  ;;  %v1415_v4 = vsub.f32 %v1273_v50, %v1395_v1 }
 0x2f5   : > { %v1430_v2 = vmul.f32 1.442695, %v1418_v63 }
 0x2f6   : > { %v1424_v5 = vmul.f32 1.442695, %v1415_v4 }
 0x2f7   : > { %3062 = vpow2.f32 %v1430_v2 }
 0x2f8   : > { %3064 = vpow2.f32 %v1434_v3 }
 0x2f9   : > { %v1413_v7 = vpop.xlane.xlu1 %1412  ;;  %3066 = vpow2.f32 %v1424_v5 }
 0x2fa   : > { %v1407_v6 = vpop.xlane.xlu0 %1406  ;;  %v1421_v9 = vsub.f32 %v1387_v54, %v1413_v7 }
 0x2fb   : > { %v1419_v8 = vsub.f32 %v1349_v53, %v1407_v6 }
 0x2fc   : > { %v1436_v14 = vmul.f32 1.442695, %v1421_v9 }
 0x2fd   : > { %v3932_v10 = vpop.eup %3062  ;;  %v1432_v12 = vmul.f32 1.442695, %v1419_v8 }
 0x2fe   : > { %v3934_v13 = vpop.eup %3064  ;;  %v1450_v15 = vsel %vm1252_vm1, %v3932_v10, 0.0 }
 0x2ff   : > { %3068 = vpow2.f32 %v1432_v12  ;;  %v1456_v16 = vsel %vm1252_vm1, %v3934_v13, 0.0  ;;  %1451 = vadd.xlane.f32.xlu2 %v1450_v15  ;;  %v3940_v21 = vpop.eup %3066 }
 0x300   : > { %3070 = vpow2.f32 %v1436_v14  ;;  %1457 = vadd.xlane.f32.xlu1 %v1456_v16  ;;  %v1441_v28 = vsel %vm1252_vm1, %v3940_v21, 0.0 }
 0x301   : > { %v1401_v20 = vpop.xlane.xlu1 %1400  ;;  %3072 = vpow2.f32 %v1422_v17 }
 0x302   : > { %v1398_v18 = vpop.xlane.xlu0 %1397  ;;  %v1417_v24 = vsub.f32 %v1311_v57, %v1401_v20 }
 0x303   : > { %v1416_v19 = vsub.f32 %v1309_v52, %v1398_v18 }
 0x304   : > { %v1428_v29 = vmul.f32 1.442695, %v1417_v24  ;;  %v2834_v24 = vld [vmem:[#allocation14 + $0x28] sm:$0xff] }
 0x305   : > { %v3069_v22 = vpop.eup %3068  ;;  %v1426_v23 = vmul.f32 1.442695, %v1416_v19  ;;  %1740 = vmatpush.bf16.msra.mxu2 %v2834_v24 }
 0x306   : > { %v3071_v25 = vpop.eup %3070  ;;  %v1453_v26 = vsel %vm1252_vm1, %v3069_v22, 0.0 }
 0x307   : > { %3074 = vpow2.f32 %v1426_v23  ;;  %1454 = vadd.xlane.f32.xlu0 %v1453_v26  ;;  %v1459_v27 = vsel %vm1252_vm1, %v3071_v25, 0.0  ;;  %v3073_v30 = vpop.eup %3072  ;;  %v2830_v26 = vld [vmem:[#allocation14 + $0x8] sm:$0xff] }
 0x308   : > { %1460 = vadd.xlane.f32.xlu2 %v1459_v27  ;;  %1442 = vadd.xlane.f32.xlu1 %v1441_v28  ;;  %3076 = vpow2.f32 %v1428_v29  ;;  %v1438_v32 = vsel %vm1252_vm1, %v3073_v30, 0.0  ;;  %v2833_v27 = vld [vmem:[#allocation14 + $0x20] sm:$0xff]  ;;  %v2835_v28 = vld [vmem:[#allocation14 + $0x30] sm:$0xff] }
 0x309   : > { %1672 = vmatpush.bf16.msra.mxu0 %v2830_v26  ;;  %1741 = vmatpush.bf16.msra.mxu2 %v2833_v27  ;;  %v2829_v29 = vld [vmem:[#allocation14] sm:$0xff] }
 0x30d   : > { %v3946_v31 = vpop.eup %3074  ;;  %1673 = vmatpush.bf16.msra.mxu0 %v2829_v29 }
 0x30e   : > { %v1444_v33 = vsel %vm1252_vm1, %v3946_v31, 0.0  ;;  %v3951_v34 = vpop.eup %3076 }
 0x30f   : > { %1439 = vadd.xlane.f32.xlu0 %v1438_v32  ;;  %v1447_v35 = vsel %vm1252_vm1, %v3951_v34, 0.0 }
 0x310   : > { %1445 = vadd.xlane.f32.xlu2 %v1444_v33 }
 0x317   : > { %1448 = vadd.xlane.f32.xlu0 %v1447_v35 }
 0x372   : > { %v1452_v43 = vpop.xlane.xlu2 %1451 }
 0x373   : > { %v1458_v44 = vpop.xlane.xlu1 %1457  ;;  %3078 = vrcp.f32 %v1452_v43 }
 0x374   : > { %3080 = vrcp.f32 %v1458_v44 }
 0x379   : > { %v3079_v47 = vpop.eup %3078 }
 0x37a   : > { %v1455_v46 = vpop.xlane.xlu0 %1454  ;;  %v3081_v50 = vpop.eup %3080  ;;  %v1474_v51 = vmul.f32 %v3079_v47, %v3932_v10 }
 0x37b   : > { %3082 = vrcp.f32 %v1455_v46  ;;  %v1443_v48 = vpop.xlane.xlu1 %1442  ;;  %v1461_v49 = vpop.xlane.xlu2 %1460  ;;  %v1476_v52 = vmul.f32 %v3081_v50, %v3934_v13 }
 0x37c   : > { %3084 = vrcp.f32 %v1443_v48  ;;  %v1482_v55 = vpack.c.bf16 %v1474_v51, %v1474_v51 }
 0x37d   : > { %3086 = vrcp.f32 %v1461_v49  ;;  %v1484_v60 = vpack.c.bf16 %v1476_v52, %v1476_v52 }
 0x37e   : > { %v1556_v63 = vunpack.c.l.b16 %v1482_v55 }
 0x37f   : > { %v1590_v3 = vunpack.c.l.b16 %v1484_v60 }
 0x381   : > { %v3083_v53 = vpop.eup %3082 }
 0x382   : > { %v3085_v54 = vpop.eup %3084  ;;  %v1475_v56 = vmul.f32 %v3083_v53, %v3069_v22  ;;  %v1440_v57 = vpop.xlane.xlu0 %1439 }
 0x383   : > { %v3087_v58 = vpop.eup %3086  ;;  %3088 = vrcp.f32 %v1440_v57  ;;  %v1446_v59 = vpop.xlane.xlu2 %1445  ;;  %v1471_v1 = vmul.f32 %v3085_v54, %v3940_v21 }
 0x384   : > { %v1483_v61 = vpack.c.bf16 %v1475_v56, %v1475_v56  ;;  %v1477_v62 = vmul.f32 %v3087_v58, %v3071_v25  ;;  %3090 = vrcp.f32 %v1446_v59  ;;  %v2836_v25 = vld [vmem:[#allocation14 + $0x38] sm:$0xff] }
 0x385   : > { %v1479_v7 = vpack.c.bf16 %v1471_v1, %v1471_v1  ;;  %1774 = vmatpush.bf16.msra.mxu3 %v2836_v25 }
 0x386   : > { %v1557_v0 = vunpack.c.l.b16 %v1483_v61  ;;  %v1485_v2 = vpack.c.bf16 %v1477_v62, %v1477_v62 }
 0x387   : > { %v1489_v13 = vunpack.c.l.b16 %v1479_v7 }
 0x388   : > { %v1591_v4 = vunpack.c.l.b16 %v1485_v2  ;;  %v1558_v5 = vpack.c.b16 %v1557_v0, %v1556_v63  ;;  %v3056_v2 = vld [vmem:[%s4146_s10] ss:$0 sm:$0xff]  ;;  %s2223_s10 = sadd.s32 %s2779_s9, %s2778_s13  ;;  %s3364_s13 = scalar_lea.hbm %s4154_s18, 64 }
 0x389   : > { %v3089_v6 = vpop.eup %3088  ;;  %1775 = vmatpush.bf16.msra.mxu3 %v2835_v28  ;;  %s2780_s29 = sshll.u32 %s2223_s10, 3 }
 0x38a   : > { %v1470_v8 = vmul.f32 %v3089_v6, %v3073_v30  ;;  %v1449_v9 = vpop.xlane.xlu0 %1448  ;;  %2603 = vmatmul.msk.bf16.vlgmr.msrb.gmra.mxu2 %vm1252_vm1, %v1558_v5  ;;  %v1592_v10 = vpack.c.b16 %v1591_v4, %v1590_v3  ;;  %v3091_v11 = vpop.eup %3090  ;;  %v2832_v30 = vld [vmem:[#allocation14 + $0x18] sm:$0xff] }
 0x38b   : > { %3092 = vrcp.f32 %v1449_v9  ;;  %v1472_v15 = vmul.f32 %v3091_v11, %v3946_v31  ;;  %1706 = vmatpush.bf16.msra.mxu1 %v2832_v30  ;;  %v2831_v31 = vld [vmem:[#allocation14 + $0x10] sm:$0xff]  ;;  %v1795_v4 = vld [vmem:[%s1794_s25] sm:$0xff] }
 0x38c   : > { %v1478_v12 = vpack.c.bf16 %v1470_v8, %v1470_v8  ;;  %2612 = vmatmul.msk.bf16.vlgmr.msrb.gmra.mxu3 %vm1252_vm1, %v1592_v10 }
 0x38d   : > { %v1480_v18 = vpack.c.bf16 %v1472_v15, %v1472_v15 }
 0x38e   : > { %v1488_v14 = vunpack.c.l.b16 %v1478_v12 }
 0x38f   : > { %v1522_v21 = vunpack.c.l.b16 %v1480_v18  ;;  %1707 = vmatpush.bf16.msra.mxu1 %v2831_v31 }
 0x390   : > { %v1490_v16 = vpack.c.b16 %v1489_v13, %v1488_v14  ;;  %v1796_v14 = vld [vmem:[%s1794_s25 + $0x8] sm:$0xff] }
 0x391   : > { %v3093_v17 = vpop.eup %3092 }
 0x392   : > { %v1473_v19 = vmul.f32 %v3093_v17, %v3951_v34  ;;  %2585 = vmatmul.msk.bf16.vlgmr.msrb.gmra.mxu0 %vm1252_vm1, %v1490_v16  ;;  %v3501_v17 = vmov 128.0  }
 0x393   : > { %3094 = vrcp.f32 %v3501_v17 }
 0x394   : > { %v1481_v20 = vpack.c.bf16 %v1473_v19, %v1473_v19 }
 0x396   : > { %v1523_v22 = vunpack.c.l.b16 %v1481_v20 }
 0x398   : > { %v1524_v23 = vpack.c.b16 %v1523_v22, %v1522_v21 }
 0x399   : > { %v3095_v18 = vpop.eup %3094 }
 0x39a   : > { %2594 = vmatmul.msk.bf16.vlgmr.msrb.gmra.mxu1 %vm1252_vm1, %v1524_v23  ;;  %v1806_v19 = vmul.f32 128.0, %v3095_v18  ;;  %vm1810_vm2 = vweird.f32 %v3095_v18 }
 0x39c   : > { %v1807_v20 = vsub.f32 1.0, %v1806_v19  ;;  %v2860_v19 = vld [vmem:[#allocation17 + $0x38] sm:$0xff] }
 0x39d   : > { %2127 = vmatpush.bf16.msrb.mxu2 %v2860_v19 }
 0x39e   : > { %v1808_v21 = vmul.f32 %v3095_v18, %v1807_v20  ;;  %v2868_v20 = vld [vmem:[#allocation17 + $0x78] sm:$0xff] }
 0x39f   : > { %2141 = vmatpush.bf16.msrb.mxu3 %v2868_v20 }
 0x3a0   : > { %v1809_v22 = vadd.f32 %v3095_v18, %v1808_v21 }
 0x3a2   : > { %v3974_v23 = vsel %vm1810_vm2, %v3095_v18, %v1809_v22 }
 0x40d   : > { %v1583_v32 = vpop.f32.mrf.mxu2 }
 0x40e   : > { %v1626_v35 = vpack.c.bf16 %v1583_v32, %v1583_v32  ;;  %v2707_v32 = vld [vmem:[#allocation16 + $0x70] sm:$0xf] }
 0x40f   : > { %v1617_v33 = vpop.f32.mrf.mxu3  ;;  %v1515_v34 = vpop.f32.mrf.mxu0 }
 0x410   : > { %v1628_v36 = vpack.c.bf16 %v1617_v33, %v1617_v33  ;;  %v1622_v38 = vpack.c.bf16 %v1515_v34, %v1515_v34  ;;  %v1716_v42 = vunpack.c.l.b16 %v1626_v35  ;;  %v2852_v33 = vld [vmem:[#allocation16 + $0x74] sm:$0xf0]  ;;  %v2851_v34 = vld [vmem:[#allocation16 + $0x74] sm:$0xf] }
 0x411   : > { %v2708_v35 = vor.u32 %v2852_v33, %v2707_v32  ;;  %v2866_v32 = vld [vmem:[#allocation17 + $0x68] sm:$0xff] }
 0x412   : > { %v1750_v47 = vunpack.c.l.b16 %v1628_v36  ;;  %v1648_v48 = vunpack.c.l.b16 %v1622_v38  ;;  %v2709_v36 = vld [vmem:[#allocation16 + $0x78] sm:$0xf0]  ;;  %v2699_v38 = vld [vmem:[#allocation16 + $0x60] sm:$0xf] }
 0x413   : > { %1961 = vmatpush.bf16.msrb.mxu0 %v2708_v35  ;;  %v2857_v35 = vld [vmem:[#allocation17 + $0x20] sm:$0xff] }
 0x415   : > { %v1585_v37 = vpop.f32.mrf.mxu2 }
 0x416   : > { %v1627_v39 = vpack.c.bf16 %v1585_v37, %v1585_v37  ;;  %v2712_v37 = vor.u32 %v2851_v34, %v2709_v36  ;;  %v2865_v36 = vld [vmem:[#allocation17 + $0x60] sm:$0xff] }
 0x417   : > { %v1619_v40 = vpop.f32.mrf.mxu3  ;;  %v1517_v41 = vpop.f32.mrf.mxu0 }
 0x418   : > { %v1717_v43 = vunpack.c.l.b16 %v1627_v39  ;;  %v1629_v44 = vpack.c.bf16 %v1619_v40, %v1619_v40  ;;  %v1623_v45 = vpack.c.bf16 %v1517_v41, %v1517_v41  ;;  %v1549_v46 = vpop.f32.mrf.mxu1  ;;  %1975 = vmatpush.bf16.msrb.mxu1 %v2712_v37  ;;  %v2850_v39 = vld [vmem:[#allocation16 + $0x64] sm:$0xf0]  ;;  %v2849_v40 = vld [vmem:[#allocation16 + $0x64] sm:$0xf] }
 0x419   : > { %v1624_v54 = vpack.c.bf16 %v1549_v46, %v1549_v46  ;;  %v2700_v41 = vor.u32 %v2850_v39, %v2699_v38  ;;  %v2847_v46 = vld [vmem:[#allocation16 + $0x54] sm:$0xf] }
 0x41a   : > { %v1718_v49 = vpack.c.b16 %v1717_v43, %v1716_v42  ;;  %v1751_v50 = vunpack.c.l.b16 %v1629_v44  ;;  %v1649_v51 = vunpack.c.l.b16 %v1623_v45  ;;  %v2701_v42 = vld [vmem:[#allocation16 + $0x68] sm:$0xf0]  ;;  %v2691_v44 = vld [vmem:[#allocation16 + $0x50] sm:$0xf]  ;;  %v2848_v45 = vld [vmem:[#allocation16 + $0x54] sm:$0xf0] }
 0x41b   : > { %v1682_v57 = vunpack.c.l.b16 %v1624_v54  ;;  %v2704_v43 = vor.u32 %v2849_v40, %v2701_v42  ;;  %1962 = vmatpush.bf16.msrb.mxu0 %v2700_v41  ;;  %v2685_v54 = vld [vmem:[#allocation16 + $0x48] sm:$0xf0] }
 0x41c   : > { %v1752_v52 = vpack.c.b16 %v1751_v50, %v1750_v47  ;;  %v1650_v53 = vpack.c.b16 %v1649_v51, %v1648_v48  ;;  %2639 = vmatmul.msk.bf16.vlgmr.msra.gmra.mxu2 %vm1252_vm1, %v1718_v49  ;;  %v2692_v47 = vor.u32 %v2848_v45, %v2691_v44  ;;  %v2693_v48 = vld [vmem:[#allocation16 + $0x58] sm:$0xf0]  ;;  %v2683_v50 = vld [vmem:[#allocation16 + $0x40] sm:$0xf]  ;;  %v2846_v51 = vld [vmem:[#allocation16 + $0x44] sm:$0xf0] }
 0x41d   : > { %1976 = vmatpush.bf16.msrb.mxu1 %v2704_v43  ;;  %v2696_v49 = vor.u32 %v2847_v46, %v2693_v48  ;;  %v3057_v46 = vld [vmem:[%s4147_s1] ss:$0 sm:$0xff] }
 0x41e   : > { %2648 = vmatmul.msk.bf16.vlgmr.msra.gmra.mxu3 %vm1252_vm1, %v1752_v52  ;;  %2621 = vmatmul.msk.bf16.vlgmr.msra.gmra.mxu0 %vm1252_vm1, %v1650_v53  ;;  %v2845_v52 = vld [vmem:[#allocation16 + $0x44] sm:$0xf]  ;;  %v2684_v53 = vor.u32 %v2846_v51, %v2683_v50  ;;  %v3058_v51 = vld [vmem:[%s4148_s19] ss:$0 sm:$0xff]  ;;  %s2225_s19 = scalar_lea.hbm %s4154_s18, %s2780_s29 }
 0x41f   : > { %1963 = vmatpush.bf16.msrb.mxu0 %v2692_v47  ;;  %s2228_s7 = sshll.u32 %s2225_s19, 4  ;;  %s2229_s7 = int_to_ptr.hbm [resolvable:$true] %s2228_s7 }
 0x420   : > { %v1551_v55 = vpop.f32.mrf.mxu1  ;;  %s3358_s15 = sshra.s32 %s2229_s7, 4  ;;  %s3359_s15 = int_to_ptr.hbm [resolvable:$true] %s3358_s15 }
 0x421   : > { %v1625_v56 = vpack.c.bf16 %v1551_v55, %v1551_v55  ;;  %1977 = vmatpush.bf16.msrb.mxu1 %v2696_v49  ;;  %v2688_v55 = vor.u32 %v2845_v52, %v2685_v54  ;;  %s3360_s11 = scalar_lea.hbm %s3359_s15, 16  ;;  %p3365_p13 = scmp.lt.s32.totalorder %s3359_s15, %s4154_s18 }
 0x422   : > { %p3361_p1 = scmp.ne.s32.totalorder %s3359_s15, %s3360_s11  ;;  %p3366_p0 = scmp.lt.s32.totalorder %s3364_s13, %s3360_s11 }
 0x423   : > { %v1683_v58 = vunpack.c.l.b16 %v1625_v56  ;;  %1964 = vmatpush.bf16.msrb.mxu0 %v2684_v53  ;;  %v2675_v56 = vld [vmem:[#allocation16 + $0x30] sm:$0xf] }
 0x424   : > { %p3362_p10 = pnand %p3361_p1, %p3744_p8  ;;  %p3367_p3 = por %p3366_p0, %p3365_p13 }
 0x425   : > { %v1684_v59 = vpack.c.b16 %v1683_v58, %v1682_v57  ;;  %1978 = vmatpush.bf16.msrb.mxu1 %v2688_v55  ;;  %v2844_v57 = vld [vmem:[#allocation16 + $0x34] sm:$0xf0]  ;;  %v2843_v58 = vld [vmem:[#allocation16 + $0x34] sm:$0xf] }
 0x426   : > { %p3363_p12 = pneg %p3362_p10 }
 0x427   : > { %2630 = vmatmul.msk.bf16.vlgmr.msra.gmra.mxu1 %vm1252_vm1, %v1684_v59  ;;  %v2676_v59 = vor.u32 %v2844_v57, %v2675_v56  ;;  %v2864_v56 = vld [vmem:[#allocation17 + $0x58] sm:$0xff]  ;;  %v2855_v57 = vld [vmem:[#allocation17 + $0x10] sm:$0xff] }
 0x428   : > { %p3368_p5 = pnand %p3367_p3, %p3363_p12 }
 0x429   : > { %1965 = vmatpush.bf16.msrb.mxu0 %v2676_v59  ;;  %v2862_v59 = vld [vmem:[#allocation17 + $0x48] sm:$0xff] }
 0x49b   : > { %v1675_v60 = vpop.f32.mrf.mxu0 }
 0x49f   : > { %v1743_v61 = vpop.f32.mrf.mxu2 }
 0x4a1   : > { %v1777_v0 = vpop.f32.mrf.mxu3 }
 0x4a3   : > { %v1677_v6 = vpop.f32.mrf.mxu0 }
 0x4a4   : > { %v1709_v62 = vpop.f32.mrf.mxu1 }
 0x4a5   : > { %v1782_v63 = vadd.f32 %v1709_v62, %v1675_v60  ;;  %v2677_v60 = vld [vmem:[#allocation16 + $0x38] sm:$0xf0]  ;;  %v2667_v62 = vld [vmem:[#allocation16 + $0x20] sm:$0xf] }
 0x4a7   : > { %v1783_v1 = vadd.f32 %v1782_v63, %v1743_v61  ;;  %v1745_v10 = vpop.f32.mrf.mxu2  ;;  %v2680_v61 = vor.u32 %v2843_v58, %v2677_v60  ;;  %v2842_v63 = vld [vmem:[#allocation16 + $0x24] sm:$0xf0]  ;;  %v2863_v58 = vld [vmem:[#allocation17 + $0x50] sm:$0xff]  ;;  %v2853_v60 = vld [vmem:[#allocation17] sm:$0xff] }
 0x4a9   : > { %v1784_v3 = vadd.f32 %v1783_v1, %v1777_v0  ;;  %v1779_v12 = vpop.f32.mrf.mxu3  ;;  %1979 = vmatpush.bf16.msrb.mxu1 %v2680_v61  ;;  %v2841_v0 = vld [vmem:[#allocation16 + $0x24] sm:$0xf]  ;;  %v2668_v1 = vor.u32 %v2842_v63, %v2667_v62  ;;  %v1875_v62 = vld [vmem:[%s4149_s23] sm:$0x3]  ;;  %s2212_s23 = scalar_lea.sflag [#allocation7], %s746_s20 }
 0x4aa   : > { %v2861_v61 = vld [vmem:[#allocation17 + $0x40] sm:$0xff] }
 0x4ab   : > { %v1792_v5 = vadd.f32 %v3056_v2, %v1784_v3  ;;  %1966 = vmatpush.bf16.msrb.mxu0 %v2668_v1  ;;  %v1877_v1 = vperm.slane %v1875_v62, 0 }
 0x4ac   : > { %v1711_v7 = vpop.f32.mrf.mxu1 }
 0x4ad   : > { %v1785_v8 = vadd.f32 %v1711_v7, %v1677_v6  ;;  %v1797_v9 = vadd.f32 %v1795_v4, %v1792_v5  ;;  %v2659_v4 = vld [vmem:[#allocation16 + $0x10] sm:$0xf]  ;;  %v2840_v5 = vld [vmem:[#allocation16 + $0x14] sm:$0xf0]  ;;  %v2839_v6 = vld [vmem:[#allocation16 + $0x14] sm:$0xf] }
 0x4ae   : > { %v2660_v7 = vor.u32 %v2840_v5, %v2659_v4 }
 0x4af   : > { %v1786_v11 = vadd.f32 %v1785_v8, %v1745_v10  ;;  %1801 = vadd.xlane.f32.xlu1 %v1797_v9  ;;  %v2661_v8 = vld [vmem:[#allocation16 + $0x18] sm:$0xf0]  ;;  %v2838_v10 = vld [vmem:[#allocation16 + $0x4] sm:$0xf0] }
 0x4b0   : > { %1967 = vmatpush.bf16.msrb.mxu0 %v2660_v7 }
 0x4b1   : > { %v1787_v13 = vadd.f32 %v1786_v11, %v1779_v12  ;;  %v2664_v12 = vor.u32 %v2839_v6, %v2661_v8 }
 0x4b3   : > { %v1793_v15 = vadd.f32 %v3056_v2, %v1787_v13  ;;  %v2669_v2 = vld [vmem:[#allocation16 + $0x28] sm:$0xf0]  ;;  %v2837_v13 = vld [vmem:[#allocation16 + $0x4] sm:$0xf] }
 0x4b4   : > { %v2672_v3 = vor.u32 %v2841_v0, %v2669_v2  ;;  %v1878_v2 = vperm.slane %v1875_v62, 1 }
 0x4b5   : > { %v1798_v16 = vadd.f32 %v1796_v14, %v1793_v15  ;;  %v2653_v14 = vld [vmem:[#allocation16 + $0x8] sm:$0xf0] }
 0x4b6   : > { %1980 = vmatpush.bf16.msrb.mxu1 %v2672_v3  ;;  %v2656_v17 = vor.u32 %v2837_v13, %v2653_v14 }
 0x4b7   : > { %1803 = vadd.xlane.f32.xlu2 %v1798_v16 }
 0x4ba   : > { %1981 = vmatpush.bf16.msrb.mxu1 %v2664_v12 }
 0x4be   : > { %1982 = vmatpush.bf16.msrb.mxu1 %v2656_v17 }
 0x522   : > { %v1802_v24 = vpop.xlane.xlu1 %1801 }
 0x523   : > { %v1812_v25 = vmul.f32 %v3974_v23, %v1802_v24  ;;  %v2859_v24 = vld [vmem:[#allocation17 + $0x30] sm:$0xff] }
 0x524   : > { %2128 = vmatpush.bf16.msrb.mxu2 %v2859_v24 }
 0x525   : > { %v3977_v26 = vsub.f32 %v1797_v9, %v1812_v25  ;;  %v2651_v9 = vld [vmem:[#allocation16] sm:$0xf]  ;;  %v2867_v25 = vld [vmem:[#allocation17 + $0x70] sm:$0xff] }
 0x526   : > { %2142 = vmatpush.bf16.msrb.mxu3 %v2867_v25 }
 0x527   : > { %v1816_v27 = vmul.f32 %v3977_v26, %v3977_v26 }
 0x529   : > { %1818 = vadd.xlane.f32.xlu0 %v1816_v27 }
 0x52a   : > { %v1804_v28 = vpop.xlane.xlu2 %1803  ;;  %2143 = vmatpush.bf16.msrb.mxu3 %v2866_v32 }
 0x52b   : > { %v1813_v29 = vmul.f32 %v3974_v23, %v1804_v28 }
 0x52d   : > { %v3982_v30 = vsub.f32 %v1798_v16, %v1813_v29  ;;  %v2652_v16 = vor.u32 %v2838_v10, %v2651_v9 }
 0x52e   : > { %2144 = vmatpush.bf16.msrb.mxu3 %v2865_v36 }
 0x52f   : > { %v1817_v31 = vmul.f32 %v3982_v30, %v3982_v30  ;;  %1968 = vmatpush.bf16.msrb.mxu0 %v2652_v16 }
 0x531   : > { %1820 = vadd.xlane.f32.xlu1 %v1817_v31  ;;  %v2858_v31 = vld [vmem:[#allocation17 + $0x28] sm:$0xff] }
 0x532   : > { %2129 = vmatpush.bf16.msrb.mxu2 %v2858_v31  ;;  %2145 = vmatpush.bf16.msrb.mxu3 %v2864_v56 }
 0x536   : > { %2130 = vmatpush.bf16.msrb.mxu2 %v2857_v35  ;;  %2146 = vmatpush.bf16.msrb.mxu3 %v2863_v58 }
 0x53a   : > { %2147 = vmatpush.bf16.msrb.mxu3 %v2862_v59 }
 0x53e   : > { %2148 = vmatpush.bf16.msrb.mxu3 %v2861_v61 }
 0x59c   : > { %v1819_v11 = vpop.xlane.xlu0 %1818 }
 0x59d   : > { %v1822_v15 = vmul.f32 %v1819_v11, %v3974_v23 }
 0x59f   : > { %v1824_v18 = vadd.f32 1e-05, %v1822_v15  ;;  %v3059_v15 = vld [vmem:[%s4150_s3] ss:$0 sm:$0xff] }
 0x5a1   : > { %3096 = vrsqrt.f32 %v1824_v18  ;;  %vm1832_vm4 = vweird.f32 %v1824_v18 }
 0x5a4   : > { %v1821_v21 = vpop.xlane.xlu1 %1820 }
 0x5a5   : > { %v1823_v22 = vmul.f32 %v1821_v21, %v3974_v23 }
 0x5a7   : > { %v3097_v27 = vpop.eup %3096  ;;  %v1825_v28 = vadd.f32 1e-05, %v1823_v22 }
 0x5a8   : > { %v1827_v29 = vmul.f32 %v3097_v27, %v1824_v18  ;;  %vm1833_vm3 = vweird.f32 %v3097_v27 }
 0x5a9   : > { %3098 = vrsqrt.f32 %v1825_v28  ;;  %vm1834_vm5 = vmor %vm1832_vm4, %vm1833_vm3  ;;  %vm1842_vm7 = vweird.f32 %v1825_v28 }
 0x5aa   : > { %v1828_v33 = vmul.f32 %v3097_v27, %v1827_v29 }
 0x5ac   : > { %v1829_v34 = vmul.f32 0.5, %v1828_v33 }
 0x5ae   : > { %v1830_v37 = vsub.f32 1.5, %v1829_v34 }
 0x5af   : > { %v3099_v38 = vpop.eup %3098 }
 0x5b0   : > { %v1831_v39 = vmul.f32 %v3097_v27, %v1830_v37  ;;  %v1837_v40 = vmul.f32 %v3099_v38, %v1825_v28  ;;  %vm1843_vm6 = vweird.f32 %v3099_v38 }
 0x5b1   : > { %vm1844_vm8 = vmor %vm1842_vm7, %vm1843_vm6 }
 0x5b2   : > { %v1838_v41 = vmul.f32 %v3099_v38, %v1837_v40  ;;  %v1835_v42 = vsel %vm1834_vm5, %v3097_v27, %v1831_v39 }
 0x5b3   : > { %v1846_v45 = vmul.f32 %v1835_v42, %v3977_v26  ;;  %v2856_v26 = vld [vmem:[#allocation17 + $0x18] sm:$0xff] }
 0x5b4   : > { %v1839_v43 = vmul.f32 0.5, %v1838_v41  ;;  %2131 = vmatpush.bf16.msrb.mxu2 %v2856_v26 }
 0x5b5   : > { %v1851_v50 = vmul.f32 %v3057_v46, %v1846_v45 }
 0x5b6   : > { %v1840_v44 = vsub.f32 1.5, %v1839_v43 }
 0x5b7   : > { %v1856_v53 = vadd.f32 %v3058_v51, %v1851_v50 }
 0x5b8   : > { %v1841_v47 = vmul.f32 %v3099_v38, %v1840_v44  ;;  %2132 = vmatpush.bf16.msrb.mxu2 %v2855_v57 }
 0x5ba   : > { %v1845_v48 = vsel %vm1844_vm8, %v3099_v38, %v1841_v47 }
 0x5bb   : > { %v1847_v49 = vmul.f32 %v1845_v48, %v3982_v30  ;;  %v2854_v30 = vld [vmem:[#allocation17 + $0x8] sm:$0xff] }
 0x5bc   : > { %2133 = vmatpush.bf16.msrb.mxu2 %v2854_v30 }
 0x5bd   : > { %v1852_v52 = vmul.f32 %v3057_v46, %v1847_v49 }
 0x5bf   : > { %v1857_v54 = vadd.f32 %v3058_v51, %v1852_v52  ;;  %v3060_v51 = vld [vmem:[%s4152_s8] ss:$0 sm:$0xff] }
 0x5c0   : > { %2134 = vmatpush.bf16.msrb.mxu2 %v2853_v60 }
 0x5c1   : > { %v1858_v55 = vpack.c.bf16 %v1857_v54, %v1856_v53 }
 0x5c3   : > { %1969 = vmatmul.bf16.vlgmr.msrb.gmra.mxu0 %v1858_v55  ;;  %1983 = vmatmul.bf16.vlgmr.msrb.gmra.mxu1 %v1858_v55 }
 0x640   : > { %v1970_v63 = vpop.f32.mrf.mxu0  ;;  %v1984_v0 = vpop.f32.mrf.mxu1 }
 0x641   : > { %v1971_v3 = vadd.f32 %v1970_v63, %v1877_v1  ;;  %v1985_v4 = vadd.f32 %v1984_v0, %v1878_v2 }
 0x643   : > { %v1989_v9 = vmax.f32 %v1971_v3, 0.0  ;;  %v1990_v10 = vmax.f32 %v1985_v4, 0.0 }
 0x648   : > { %v1972_v5 = vpop.f32.mrf.mxu0  ;;  %v1986_v6 = vpop.f32.mrf.mxu1 }
 0x649   : > { %v1973_v7 = vadd.f32 %v1972_v5, %v1877_v1  ;;  %v1987_v8 = vadd.f32 %v1986_v6, %v1878_v2 }
 0x64b   : > { %v1991_v11 = vmax.f32 %v1973_v7, 0.0  ;;  %v1992_v12 = vmax.f32 %v1987_v8, 0.0 }
 0x64d   : > { %v1993_v13 = vpack.c.bf16 %v1991_v11, %v1989_v9  ;;  %v1994_v14 = vpack.c.bf16 %v1992_v12, %v1990_v10 }
 0x64f   : > { %2135 = vmatmul.bf16.vlgmr.msrb.gmra.mxu2 %v1993_v13  ;;  %2149 = vmatmul.bf16.vlgmr.msrb.gmra.mxu3 %v1994_v14 }
 0x6d2   : > { %v2136_v16 = vpop.f32.mrf.mxu2  ;;  %v2150_v17 = vpop.f32.mrf.mxu3 }
 0x6d3   : > { %v2137_v18 = vadd.f32 %v3059_v15, %v2136_v16 }
 0x6d5   : > { %v2151_v19 = vadd.f32 %v2150_v17, %v2137_v18 }
 0x6d7   : > { %v2155_v20 = vadd.f32 %v2151_v19, %v1856_v53 }
 0x6d9   : > { %2159 = vadd.xlane.f32.xlu2 %v2155_v20 }
 0x6da   : > { %v2138_v21 = vpop.f32.mrf.mxu2  ;;  %v2152_v24 = vpop.f32.mrf.mxu3 }
 0x6db   : > { %v2139_v22 = vadd.f32 %v3059_v15, %v2138_v21 }
 0x6dd   : > { %v2153_v25 = vadd.f32 %v2152_v24, %v2139_v22 }
 0x6df   : > { %v2156_v27 = vadd.f32 %v2153_v25, %v1857_v54  ;;  %v3061_v54 = vld [vmem:[%s4153_s6] ss:$0 sm:$0xff] }
 0x6e1   : > { %2161 = vadd.xlane.f32.xlu0 %v2156_v27 }
 0x74c   : > { %v2160_v28 = vpop.xlane.xlu2 %2159 }
 0x74d   : > { %v2163_v29 = vmul.f32 %v2160_v28, %v3974_v23 }
 0x74f   : > { %v2165_v31 = vsub.f32 %v2155_v20, %v2163_v29 }
 0x751   : > { %v2167_v32 = vmul.f32 %v2165_v31, %v2165_v31 }
 0x753   : > { %2169 = vadd.xlane.f32.xlu1 %v2167_v32 }
 0x754   : > { %v2162_v33 = vpop.xlane.xlu0 %2161 }
 0x755   : > { %v2164_v34 = vmul.f32 %v2162_v33, %v3974_v23 }
 0x757   : > { %v2166_v35 = vsub.f32 %v2156_v27, %v2164_v34 }
 0x759   : > { %v2168_v36 = vmul.f32 %v2166_v35, %v2166_v35 }
 0x75b   : > { %2171 = vadd.xlane.f32.xlu2 %v2168_v36 }
 0x7c6   : > { %v2170_v37 = vpop.xlane.xlu1 %2169 }
 0x7c7   : > { %v2173_v38 = vmul.f32 %v2170_v37, %v3974_v23 }
 0x7c9   : > { %v2175_v39 = vadd.f32 1e-05, %v2173_v38 }
 0x7cb   : > { %3100 = vrsqrt.f32 %v2175_v39  ;;  %vm2183_vm10 = vweird.f32 %v2175_v39 }
 0x7ce   : > { %v2172_v40 = vpop.xlane.xlu2 %2171 }
 0x7cf   : > { %v2174_v41 = vmul.f32 %v2172_v40, %v3974_v23 }
 0x7d1   : > { %v3101_v42 = vpop.eup %3100  ;;  %v2176_v43 = vadd.f32 1e-05, %v2174_v41 }
 0x7d2   : > { %v2178_v44 = vmul.f32 %v3101_v42, %v2175_v39  ;;  %vm2184_vm9 = vweird.f32 %v3101_v42 }
 0x7d3   : > { %3102 = vrsqrt.f32 %v2176_v43  ;;  %vm2185_vm11 = vmor %vm2183_vm10, %vm2184_vm9  ;;  %vm2193_vm13 = vweird.f32 %v2176_v43 }
 0x7d4   : > { %v2179_v45 = vmul.f32 %v3101_v42, %v2178_v44 }
 0x7d6   : > { %v2180_v46 = vmul.f32 0.5, %v2179_v45 }
 0x7d8   : > { %v2181_v47 = vsub.f32 1.5, %v2180_v46 }
 0x7d9   : > { %v3103_v48 = vpop.eup %3102 }
 0x7da   : > { %v2182_v49 = vmul.f32 %v3101_v42, %v2181_v47  ;;  %v2188_v50 = vmul.f32 %v3103_v48, %v2176_v43  ;;  %vm2194_vm12 = vweird.f32 %v3103_v48 }
 0x7db   : > { %vm2195_vm14 = vmor %vm2193_vm13, %vm2194_vm12 }
 0x7dc   : > { %v2186_v23 = vsel %vm2185_vm11, %v3101_v42, %v2182_v49  ;;  %v2189_v52 = vmul.f32 %v3103_v48, %v2188_v50 }
 0x7dd   : > { %v2197_v53 = vmul.f32 %v2186_v23, %v2165_v31 }
 0x7de   : > { %v2190_v55 = vmul.f32 0.5, %v2189_v52 }
 0x7df   : > { %v2202_v26 = vmul.f32 %v3060_v51, %v2197_v53 }
 0x7e0   : > { %v2191_v56 = vsub.f32 1.5, %v2190_v55 }
 0x7e1   : > { %v2207_v57 = vadd.f32 %v3061_v54, %v2202_v26 }
 0x7e2   : > { %v2192_v58 = vmul.f32 %v3103_v48, %v2191_v56 }
 0x7e3   : > { %2209 = vst [vmem:[%s3811_s12] sm:$0xff] %v2207_v57 }
 0x7e4   : > { %v2196_v30 = vsel %vm2195_vm14, %v3103_v48, %v2192_v58 }
 0x7e5   : > { %v2198_v59 = vmul.f32 %v2196_v30, %v2166_v35 }
 0x7e7   : > { %v2203_v60 = vmul.f32 %v3060_v51, %v2198_v59 }
 0x7e9   : > { %v2208_v61 = vadd.f32 %v3061_v54, %v2203_v60 }
 0x7eb   : > { %2210 = vst [vmem:[%s3811_s12 + $0x8] sm:$0xff] %v2208_v61 }
 0x7ec   : > { %3371 = shalt.err (!%p3368_p5)
}
 0x7ed   : > { %s3502_s20 = smov 128   ;;  %s3503_s12 = smov 8  }
 0x7ee   : > { %2905 = dma.vmem_to_hbm [thread:$0]  (%p3744_p8), %s2227_s22, 256, %s2229_s7, %s2212_s23, %s3502_s20, %s3502_s20, %s3503_s12  }
 0x7ef PF: > { %p2950_p6 = scmp.ge.s32.totalorder %s3486_s21, 2  ;;  %s2243_s14 = sand.u32 1, %s3446_s27  }
 0x7f0   : > { %s2244_s8 = scalar_lea.sflag [#allocation7], %s2243_s14 }
 0x7f1   : > { %p2934_p7 = pnand %p2950_p6, %p3754_p9 }
 0x7f3   : > { %p2935_p11 = pneg %p2934_p7 }
 0x7f5   : > { %3441 = dma.done.wait (%p2935_p11), %s2244_s8, 256  }
 0x7f6   : > { %3443 = vsyncadd (%p2935_p11), %s2244_s8, 4294967040  ;;  %s40_s21 = sadd.s32 1, %s3486_s21   ;;  %s4155_s4 = sld [smem:[#allocation27_spill]] }
 0x7f7   : > { %p37_p2 = scmp.ge.s32.totalorder %s40_s21, 6   ;;  %s4156_s30 = sld [smem:[#allocation35_spill]] }
 0x7f8   : > { %s4157_s10 = sld [smem:[#allocation30_spill]]  ;;  %s4161_s27 = smov %s3450_s28 }
 0x7f9   : > { %s4158_s19 = sld [smem:[#allocation31_spill]]  ;;  %s4162_s28 = smov %s3454_s16 }
 0x7fa   : > { %s4159_s1 = sld [smem:[#allocation33_spill]]  ;;  %s4163_s16 = smov %s3752_s0 }
 0x7fb   : > { %s4160_s20 = sld [smem:[#allocation34_spill]]  ;;  %s4164_s29 = smov %s3462_s17 }
 0x7fc   : > { %s4165_s17 = smov %s4155_s4  ;;  %39 = sbr.rel (!%p37_p2) target bundleno = 32 (0x20), region = 189 }
 0x7fe   : > { %s4166_s0 = smov %s4157_s10 }
 0x801   :  { %2250 = vsyncpa [#allocation6], 1 }
 0x802   :  { %2252 = vsyncpa [#allocation6 + $0x1], 1 }
 0x803   :  { %2253 = vsyncpa [#allocation9], 1 }
 0x804   :  { %2255 = vsyncpa [#allocation9 + $0x1], 1 }
 0x805   :  { %2256 = vsyncpa [#allocation12], 1 }
 0x806   :  { %2257 = vsyncpa [#allocation15], 1 }
 0x807   :  { %2258 = vsyncpa [#allocation18], 1 }
 0x808   :  { %2259 = vsyncpa [#allocation7], 1 }
 0x809   :  { %2261 = vsyncpa [#allocation7 + $0x1], 1 }

</bundles_post_ra>
